<compile_context>
chip_gen: v7x
topology: tpu7x:2x2x1
jax: 0.10.0
libtpu: 0.0.40
codegen_flags: <defaults>
</compile_context>

<pallas_src>
import functools
import math

import jax
import jax.numpy as jnp
from jax import lax
from jax.experimental import pallas as pl
from jax.experimental.pallas import tpu as pltpu


def _round_up(x: int, m: int) -> int:
    return ((x + m - 1) // m) * m


# ----------------------------------------------------------------------------
# Fused multi-layer LSTM kernel (single pallas_call, time loop inside).
# Gate order follows PyTorch: i, f, g, o.
# ----------------------------------------------------------------------------
def _lstm_stack_kernel(x_ref, w_ref, b_ref, h0_ref, c0_ref,
                       y_ref, hT_ref, cT_ref, act_scr):
    T, B, Din = x_ref.shape
    L = w_ref.shape[0]
    H = y_ref.shape[-1]

    if H < Din:
        # Tail columns of the inter-layer buffer must hold defined (zero) data;
        # they multiply zero-padded weight rows so they never contribute.
        act_scr[...] = jnp.zeros_like(act_scr)

    for l in range(L):                              # static unroll over layers
        w_l = w_ref[l]                              # (Din + H, 4H) bf16, loop-invariant
        b_l = b_ref[l]                              # (1, 4H) f32

        def step(t, carry, l=l, w_l=w_l, b_l=b_l):
            h_prev, c_prev = carry                  # f32 (B, H)
            x_t = x_ref[t] if l == 0 else act_scr[t]            # (B, Din) bf16
            xh = jnp.concatenate([x_t, h_prev.astype(jnp.bfloat16)], axis=-1)
            gates = jnp.dot(xh, w_l, preferred_element_type=jnp.float32) + b_l
            i_g = jax.nn.sigmoid(gates[:, 0 * H:1 * H])
            f_g = jax.nn.sigmoid(gates[:, 1 * H:2 * H])
            g_g = jnp.tanh(gates[:, 2 * H:3 * H])
            o_g = jax.nn.sigmoid(gates[:, 3 * H:4 * H])
            c_new = f_g * c_prev + i_g * g_g
            h_new = o_g * jnp.tanh(c_new)
            if l == L - 1:
                y_ref[t] = h_new.astype(y_ref.dtype)
            elif H == Din:
                act_scr[t] = h_new.astype(act_scr.dtype)
            else:
                act_scr[t, :, :H] = h_new.astype(act_scr.dtype)
            return (h_new, c_new)

        hT, cT = lax.fori_loop(
            0, T, step,
            (h0_ref[l].astype(jnp.float32), c0_ref[l].astype(jnp.float32)))
        # Written once per layer (no pl.when on the last grid step needed).
        hT_ref[l] = hT.astype(hT_ref.dtype)
        cT_ref[l] = cT.astype(cT_ref.dtype)


def lstm_stack(x, w, b, h0, c0):
    """x: (T, B, Din) bf16; w: (L, Din+H, 4H) bf16; b: (L, 1, 4H) f32;
    h0, c0: (L, B, H) f32.  Returns y (T, B, H) bf16 and hT, cT (L, B, H) f32."""
    T, B, Din = x.shape
    L, KH, H4 = w.shape
    H = H4 // 4
    grid_spec = pltpu.PrefetchScalarGridSpec(
        num_scalar_prefetch=0,
        grid=(1,),
        in_specs=[
            pl.BlockSpec((T, B, Din), lambda i: (0, 0, 0)),
            pl.BlockSpec((L, KH, H4), lambda i: (0, 0, 0)),
            pl.BlockSpec((L, 1, H4), lambda i: (0, 0, 0)),
            pl.BlockSpec((L, B, H), lambda i: (0, 0, 0)),
            pl.BlockSpec((L, B, H), lambda i: (0, 0, 0)),
        ],
        out_specs=(
            pl.BlockSpec((T, B, H), lambda i: (0, 0, 0)),
            pl.BlockSpec((L, B, H), lambda i: (0, 0, 0)),
            pl.BlockSpec((L, B, H), lambda i: (0, 0, 0)),
        ),
        scratch_shapes=[pltpu.VMEM((T, B, Din), jnp.bfloat16)],
    )
    return pl.pallas_call(
        _lstm_stack_kernel,
        grid_spec=grid_spec,
        out_shape=(
            jax.ShapeDtypeStruct((T, B, H), jnp.bfloat16),
            jax.ShapeDtypeStruct((L, B, H), jnp.float32),
            jax.ShapeDtypeStruct((L, B, H), jnp.float32),
        ),
        compiler_params=pltpu.CompilerParams(
            dimension_semantics=("arbitrary",)),   # sequential (single step)
    )(x, w, b, h0, c0)


# ----------------------------------------------------------------------------
# Decoder + log_softmax kernel: row-tiled, (tn, H) @ (H, V) + b -> log_softmax.
# ----------------------------------------------------------------------------
def _decoder_kernel(x_ref, w_ref, b_ref, out_ref):
    logits = (jnp.dot(x_ref[...], w_ref[...],
                      preferred_element_type=jnp.float32) + b_ref[...])
    m = jnp.max(logits, axis=-1, keepdims=True)
    shifted = logits - m
    lse = jnp.log(jnp.sum(jnp.exp(shifted), axis=-1, keepdims=True))
    out_ref[...] = (shifted - lse).astype(out_ref.dtype)


def decoder_log_softmax(x, w, b, *, max_row_tile=256):
    """x: (N, H) bf16; w: (H, V) bf16; b: (1, V) f32 -> (N, V) f32 log-probs."""
    N, H = x.shape
    V = w.shape[1]
    tn = 8
    for cand in range(8, min(N, max_row_tile) + 1, 8):
        if N % cand == 0:
            tn = cand
    grid_spec = pltpu.PrefetchScalarGridSpec(
        num_scalar_prefetch=0,
        grid=(N // tn,),
        in_specs=[
            pl.BlockSpec((tn, H), lambda i: (i, 0)),
            pl.BlockSpec((H, V), lambda i: (0, 0)),
            pl.BlockSpec((1, V), lambda i: (0, 0)),
        ],
        out_specs=pl.BlockSpec((tn, V), lambda i: (i, 0)),
    )
    return pl.pallas_call(
        _decoder_kernel,
        grid_spec=grid_spec,
        out_shape=jax.ShapeDtypeStruct((N, V), jnp.float32),
        compiler_params=pltpu.CompilerParams(
            dimension_semantics=("parallel",)),    # independent rows -> megacore
    )(x, w, b)


# ----------------------------------------------------------------------------
# Parameters: PyTorch-faithful init + one-time prepack (transpose/stack/pad/bf16).
# ----------------------------------------------------------------------------
def init_params(key, ntoken, ninp, nhid, nlayers):
    ks = jax.random.split(key, 3 + 4 * nlayers)
    initrange = 0.1
    stdv = 1.0 / math.sqrt(nhid)
    params = {
        "emb": jax.random.uniform(ks[0], (ntoken, ninp), jnp.float32,
                                  -initrange, initrange),
        "dec_w": jax.random.uniform(ks[1], (ntoken, nhid), jnp.float32,
                                    -initrange, initrange),
        "dec_b": jax.random.uniform(ks[2], (ntoken,), jnp.float32, -stdv, stdv),
    }
    for l in range(nlayers):
        d_in = ninp if l == 0 else nhid
        k0, k1, k2, k3 = ks[3 + 4 * l: 3 + 4 * (l + 1)]
        params[f"w_ih_{l}"] = jax.random.uniform(
            k0, (4 * nhid, d_in), jnp.float32, -stdv, stdv)
        params[f"w_hh_{l}"] = jax.random.uniform(
            k1, (4 * nhid, nhid), jnp.float32, -stdv, stdv)
        params[f"b_ih_{l}"] = jax.random.uniform(
            k2, (4 * nhid,), jnp.float32, -stdv, stdv)
        params[f"b_hh_{l}"] = jax.random.uniform(
            k3, (4 * nhid,), jnp.float32, -stdv, stdv)
    return params


def _pad_gate_cols(w, nhid, h_pad):
    # (in_dim, 4*nhid) -> (in_dim, 4*h_pad), zero-padding each gate block.
    in_dim = w.shape[0]
    w4 = w.reshape(in_dim, 4, nhid)
    w4 = jnp.pad(w4, ((0, 0), (0, 0), (0, h_pad - nhid)))
    return w4.reshape(in_dim, 4 * h_pad)


def prepare_params(params, ntoken, ninp, nhid, nlayers):
    h_pad = _round_up(nhid, 128)
    din_pad = max(_round_up(ninp, 128), h_pad)
    v_pad = _round_up(ntoken, 128)

    w_stack, b_stack = [], []
    for l in range(nlayers):
        w_ih_t = _pad_gate_cols(params[f"w_ih_{l}"].T, nhid, h_pad)
        w_hh_t = _pad_gate_cols(params[f"w_hh_{l}"].T, nhid, h_pad)
        w_ih_t = jnp.pad(w_ih_t, ((0, din_pad - w_ih_t.shape[0]), (0, 0)))
        w_hh_t = jnp.pad(w_hh_t, ((0, h_pad - w_hh_t.shape[0]), (0, 0)))
        w_stack.append(jnp.concatenate([w_ih_t, w_hh_t], axis=0))
        bias = (params[f"b_ih_{l}"] + params[f"b_hh_{l}"]).reshape(4, nhid)
        bias = jnp.pad(bias, ((0, 0), (0, h_pad - nhid))).reshape(1, 4 * h_pad)
        b_stack.append(bias)

    dec_w = jnp.pad(params["dec_w"].T, ((0, h_pad - nhid), (0, v_pad - ntoken)))
    dec_b = jnp.pad(params["dec_b"], (0, v_pad - ntoken),
                    constant_values=-1e30)[None, :]

    return {
        "emb": jnp.pad(params["emb"],
                       ((0, 0), (0, din_pad - ninp))).astype(jnp.bfloat16),
        "w_lstm": jnp.stack(w_stack).astype(jnp.bfloat16),    # (L, Din+H, 4H)
        "b_lstm": jnp.stack(b_stack).astype(jnp.float32),     # (L, 1, 4H)
        "dec_w": dec_w.astype(jnp.bfloat16),                  # (H, V)
        "dec_b": dec_b.astype(jnp.float32),                   # (1, V)
    }


# ----------------------------------------------------------------------------
# Forward pass (glue in plain JAX, hot paths in Pallas).
# ----------------------------------------------------------------------------
@functools.partial(jax.jit, static_argnames=("ntoken", "nhid"))
def rnn_model_forward(prep, text, hidden, *, ntoken, nhid):
    """text: (T, B) int32 token ids; hidden = (h0, c0) each (nlayers, B, nhid).
    Returns (log_probs (T*B, ntoken), (hN, cN))."""
    h0, c0 = hidden
    B = h0.shape[1]
    T = text.shape[0]
    h_pad = prep["w_lstm"].shape[-1] // 4
    b_pad = _round_up(B, 8)

    # Text encoder (gather) + eval-mode dropout (identity).
    emb = jnp.take(prep["emb"], text, axis=0)                      # (T, B, Din) bf16
    x = jnp.pad(emb, ((0, 0), (0, b_pad - B), (0, 0)))
    h0p = jnp.pad(h0, ((0, 0), (0, b_pad - B), (0, h_pad - nhid))).astype(jnp.float32)
    c0p = jnp.pad(c0, ((0, 0), (0, b_pad - B), (0, h_pad - nhid))).astype(jnp.float32)

    y, hT, cT = lstm_stack(x, prep["w_lstm"], prep["b_lstm"], h0p, c0p)

    logp_pad = decoder_log_softmax(y.reshape(T * b_pad, h_pad),
                                   prep["dec_w"], prep["dec_b"])
    logp = logp_pad.reshape(T, b_pad, -1)[:, :B, :ntoken].reshape(T * B, ntoken)
    return logp, (hT[:, :B, :nhid], cT[:, :B, :nhid])


# ----------------------------------------------------------------------------
# Pure-JAX reference (bf16-rounded operands to mirror the kernel's precision).
# ----------------------------------------------------------------------------
def reference_forward(params, text, hidden, nlayers, ntoken):
    def r(a):
        return a.astype(jnp.bfloat16).astype(jnp.float32)

    h0, c0 = hidden
    x = r(jnp.take(params["emb"], text, axis=0))
    hs, cs = [], []
    for l in range(nlayers):
        w_ih, w_hh = r(params[f"w_ih_{l}"]), r(params[f"w_hh_{l}"])
        b = params[f"b_ih_{l}"] + params[f"b_hh_{l}"]
        H = w_hh.shape[1]

        def step(carry, x_t, w_ih=w_ih, w_hh=w_hh, b=b, H=H):
            h, c = carry
            gates = x_t @ w_ih.T + r(h) @ w_hh.T + b
            i = jax.nn.sigmoid(gates[:, :H])
            f = jax.nn.sigmoid(gates[:, H:2 * H])
            g = jnp.tanh(gates[:, 2 * H:3 * H])
            o = jax.nn.sigmoid(gates[:, 3 * H:4 * H])
            c = f * c + i * g
            h = o * jnp.tanh(c)
            return (h, c), h

        (hT, cT), y = lax.scan(step, (h0[l], c0[l]), x)
        x = r(y)
        hs.append(hT)
        cs.append(cT)
    logits = x.reshape(-1, x.shape[-1]) @ r(params["dec_w"]).T + params["dec_b"]
    return jax.nn.log_softmax(logits, axis=-1), (jnp.stack(hs), jnp.stack(cs))


if __name__ == "__main__":
    ntoken, ninp, nhid, nlayers = 50, 32, 32, 2
    T, B = 8, 2

    key = jax.random.PRNGKey(0)
    kp, kt = jax.random.split(key)
    params = init_params(kp, ntoken, ninp, nhid, nlayers)
    prep = prepare_params(params, ntoken, ninp, nhid, nlayers)

    text = jax.random.randint(kt, (T, B), 0, ntoken, dtype=jnp.int32)
    h0 = jnp.zeros((nlayers, B, nhid), jnp.float32)
    c0 = jnp.zeros((nlayers, B, nhid), jnp.float32)

    logp, (hN, cN) = rnn_model_forward(prep, text, (h0, c0),
                                       ntoken=ntoken, nhid=nhid)
    jax.block_until_ready((logp, hN, cN))

    assert logp.shape == (T * B, ntoken)
    assert hN.shape == (nlayers, B, nhid) and cN.shape == (nlayers, B, nhid)
    # log_softmax rows must sum to 1 in prob space (padded vocab contributes 0).
    assert bool(jnp.allclose(jnp.sum(jnp.exp(logp), axis=1), 1.0, atol=1e-4))

    ref_logp, (ref_h, ref_c) = reference_forward(params, text, (h0, c0),
                                                 nlayers, ntoken)
    assert bool(jnp.max(jnp.abs(logp - ref_logp)) < 5e-2)
    assert bool(jnp.max(jnp.abs(hN - ref_h)) < 5e-2)
    assert bool(jnp.max(jnp.abs(cN - ref_c)) < 5e-2)
    print("KERNEL_OK")
</pallas_src>

<mosaic_0001>
module attributes {stable_mosaic.version = 11 : i64} {
  func.func @_decoder_kernel(%arg0: i32, %arg1: memref<64x128xbf16, #tpu.memory_space<vmem>>, %arg2: memref<128x128xbf16, #tpu.memory_space<vmem>>, %arg3: memref<1x128xf32, #tpu.memory_space<vmem>>, %arg4: memref<64x128xf32, #tpu.memory_space<vmem>>) attributes {dimension_semantics = [#tpu.dimension_semantics<parallel>], iteration_bounds = array<i64: 1>, scalar_prefetch = 0 : i64, scratch_operands = 0 : i64, tpu.core_type = #tpu.core_type<tc>, window_params = [{transform_indices = @transform_0, window_bounds = array<i64: 64, 128>}, {pipeline_mode = #tpu.pipeline_mode<synchronous>, transform_indices = @transform_1, window_bounds = array<i64: 128, 128>}, {pipeline_mode = #tpu.pipeline_mode<synchronous>, transform_indices = @transform_2, window_bounds = array<i64: 1, 128>}, {transform_indices = @transform_3, window_bounds = array<i64: 64, 128>}]} {
    %c0 = arith.constant 0 : index
    %c0_0 = arith.constant 0 : index
    %0 = vector.load %arg1[%c0, %c0_0] : memref<64x128xbf16, #tpu.memory_space<vmem>>, vector<64x128xbf16>
    %c0_1 = arith.constant 0 : index
    %c0_2 = arith.constant 0 : index
    %1 = vector.load %arg2[%c0_1, %c0_2] : memref<128x128xbf16, #tpu.memory_space<vmem>>, vector<128x128xbf16>
    %cst = arith.constant dense<0.000000e+00> : vector<64x128xf32>
    %2 = tpu.matmul %0, %1, %cst {dimension_numbers = #tpu.dot_dimension_numbers<[1], [0], [0], [1], [0, 0, 1, 1], [], []>} : vector<64x128xbf16>, vector<128x128xbf16>, vector<64x128xf32> -> vector<64x128xf32>
    %c0_3 = arith.constant 0 : index
    %c0_4 = arith.constant 0 : index
    %3 = vector.load %arg3[%c0_3, %c0_4] : memref<1x128xf32, #tpu.memory_space<vmem>>, vector<1x128xf32>
    %4 = vector.broadcast %3 : vector<1x128xf32> to vector<64x128xf32>
    %5 = arith.addf %2, %4 : vector<64x128xf32>
    %cst_5 = arith.constant dense<0xFF800000> : vector<64xf32>
    %6 = vector.multi_reduction <maximumf>, %5, %cst_5 [1] : vector<64x128xf32> to vector<64xf32>
    %7 = vector.shape_cast %6 : vector<64xf32> to vector<64x1xf32>
    %8 = vector.broadcast %7 : vector<64x1xf32> to vector<64x128xf32>
    %9 = arith.subf %5, %8 : vector<64x128xf32>
    %10 = math.exp %9 : vector<64x128xf32>
    %cst_6 = arith.constant dense<0.000000e+00> : vector<64xf32>
    %11 = vector.multi_reduction <add>, %10, %cst_6 [1] : vector<64x128xf32> to vector<64xf32>
    %12 = vector.shape_cast %11 : vector<64xf32> to vector<64x1xf32>
    %13 = math.log %12 : vector<64x1xf32>
    %14 = vector.broadcast %13 : vector<64x1xf32> to vector<64x128xf32>
    %15 = arith.subf %9, %14 : vector<64x128xf32>
    %c0_7 = arith.constant 0 : index
    %c0_8 = arith.constant 0 : index
    %16 = vector.load %arg4[%c0_7, %c0_8] : memref<64x128xf32, #tpu.memory_space<vmem>>, vector<64x128xf32>
    tpu.vector_store %arg4[%c0_7, %c0_8], %15 {strides = array<i32>} : memref<64x128xf32, #tpu.memory_space<vmem>>, vector<64x128xf32>,
    return
  }
  func.func @transform_0(%arg0: i32) -> (i32, i32) {
    %c0_i32 = arith.constant 0 : i32
    %c0_i32_0 = arith.constant 0 : i32
    return %arg0, %c0_i32 : i32, i32
  }
  func.func @transform_1(%arg0: i32) -> (i32, i32) {
    %c0_i32 = arith.constant 0 : i32
    %c0_i32_0 = arith.constant 0 : i32
    %c0_i32_1 = arith.constant 0 : i32
    return %c0_i32, %c0_i32_0 : i32, i32
  }
  func.func @transform_2(%arg0: i32) -> (i32, i32) {
    %c0_i32 = arith.constant 0 : i32
    %c0_i32_0 = arith.constant 0 : i32
    %c0_i32_1 = arith.constant 0 : i32
    return %c0_i32, %c0_i32_0 : i32, i32
  }
  func.func @transform_3(%arg0: i32) -> (i32, i32) {
    %c0_i32 = arith.constant 0 : i32
    %c0_i32_0 = arith.constant 0 : i32
    return %arg0, %c0_i32 : i32, i32
  }
}

module attributes {stable_mosaic.version = 11 : i64} {
  func.func @_lstm_stack_kernel(%arg0: i32, %arg1: memref<8x8x128xbf16, #tpu.memory_space<vmem>>, %arg2: memref<2x256x512xbf16, #tpu.memory_space<vmem>>, %arg3: memref<2x1x512xf32, #tpu.memory_space<vmem>>, %arg4: memref<2x8x128xf32, #tpu.memory_space<vmem>>, %arg5: memref<2x8x128xf32, #tpu.memory_space<vmem>>, %arg6: memref<8x8x128xbf16, #tpu.memory_space<vmem>>, %arg7: memref<2x8x128xf32, #tpu.memory_space<vmem>>, %arg8: memref<2x8x128xf32, #tpu.memory_space<vmem>>, %arg9: memref<8x8x128xbf16, #tpu.memory_space<vmem>>) attributes {dimension_semantics = [#tpu.dimension_semantics<arbitrary>], iteration_bounds = array<i64: 1>, scalar_prefetch = 0 : i64, scratch_operands = 1 : i64, tpu.core_type = #tpu.core_type<tc>, window_params = [{pipeline_mode = #tpu.pipeline_mode<synchronous>, transform_indices = @transform_0, window_bounds = array<i64: 8, 8, 128>}, {pipeline_mode = #tpu.pipeline_mode<synchronous>, transform_indices = @transform_1, window_bounds = array<i64: 2, 256, 512>}, {pipeline_mode = #tpu.pipeline_mode<synchronous>, transform_indices = @transform_2, window_bounds = array<i64: 2, 1, 512>}, {pipeline_mode = #tpu.pipeline_mode<synchronous>, transform_indices = @transform_3, window_bounds = array<i64: 2, 8, 128>}, {pipeline_mode = #tpu.pipeline_mode<synchronous>, transform_indices = @transform_4, window_bounds = array<i64: 2, 8, 128>}, {pipeline_mode = #tpu.pipeline_mode<synchronous>, transform_indices = @transform_5, window_bounds = array<i64: 8, 8, 128>}, {pipeline_mode = #tpu.pipeline_mode<synchronous>, transform_indices = @transform_6, window_bounds = array<i64: 2, 8, 128>}, {pipeline_mode = #tpu.pipeline_mode<synchronous>, transform_indices = @transform_7, window_bounds = array<i64: 2, 8, 128>}]} {
    %c0 = arith.constant 0 : index
    %c0_0 = arith.constant 0 : index
    %c0_1 = arith.constant 0 : index
    %0 = vector.load %arg2[%c0, %c0_0, %c0_1] : memref<2x256x512xbf16, #tpu.memory_space<vmem>>, vector<1x256x512xbf16>
    %1 = vector.shape_cast %0 : vector<1x256x512xbf16> to vector<256x512xbf16>
    %c0_2 = arith.constant 0 : index
    %c0_3 = arith.constant 0 : index
    %c0_4 = arith.constant 0 : index
    %2 = vector.load %arg3[%c0_2, %c0_3, %c0_4] : memref<2x1x512xf32, #tpu.memory_space<vmem>>, vector<1x1x512xf32>
    %3 = vector.shape_cast %2 : vector<1x1x512xf32> to vector<1x512xf32>
    %c0_5 = arith.constant 0 : index
    %c0_6 = arith.constant 0 : index
    %c0_7 = arith.constant 0 : index
    %4 = vector.load %arg4[%c0_5, %c0_6, %c0_7] : memref<2x8x128xf32, #tpu.memory_space<vmem>>, vector<1x8x128xf32>
    %5 = vector.shape_cast %4 : vector<1x8x128xf32> to vector<8x128xf32>
    %c0_8 = arith.constant 0 : index
    %c0_9 = arith.constant 0 : index
    %c0_10 = arith.constant 0 : index
    %6 = vector.load %arg5[%c0_8, %c0_9, %c0_10] : memref<2x8x128xf32, #tpu.memory_space<vmem>>, vector<1x8x128xf32>
    %7 = vector.shape_cast %6 : vector<1x8x128xf32> to vector<8x128xf32>
    %c0_i32 = arith.constant 0 : i32
    %c8_i32 = arith.constant 8 : i32
    %8 = arith.addi %c0_i32, %c8_i32 : i32
    %c1_i32 = arith.constant 1 : i32
    %9:2 = scf.for %arg10 = %c0_i32 to %8 step %c1_i32 iter_args(%arg11 = %5, %arg12 = %7) -> (vector<8x128xf32>, vector<8x128xf32>)  : i32 {
      %32 = arith.index_cast %arg10 : i32 to index
      %c0_39 = arith.constant 0 : index
      %c0_40 = arith.constant 0 : index
      %33 = vector.load %arg1[%32, %c0_39, %c0_40] : memref<8x8x128xbf16, #tpu.memory_space<vmem>>, vector<1x8x128xbf16>
      %34 = vector.shape_cast %33 : vector<1x8x128xbf16> to vector<8x128xbf16>
      %35 = arith.truncf %arg11 : vector<8x128xf32> to vector<8x128xbf16>
      %36 = tpu.concatenate %34, %35 in 1 : vector<8x128xbf16>, vector<8x128xbf16> -> vector<8x256xbf16>
      %cst = arith.constant dense<0.000000e+00> : vector<8x512xf32>
      %37 = tpu.matmul %36, %1, %cst {dimension_numbers = #tpu.dot_dimension_numbers<[1], [0], [0], [1], [0, 0, 1, 1], [], []>} : vector<8x256xbf16>, vector<256x512xbf16>, vector<8x512xf32> -> vector<8x512xf32>
      %38 = vector.broadcast %3 : vector<1x512xf32> to vector<8x512xf32>
      %39 = arith.addf %37, %38 : vector<8x512xf32>
      %40 = vector.extract_strided_slice %39 {offsets = [0, 0], sizes = [8, 128], strides = [1, 1]} : vector<8x512xf32> to vector<8x128xf32>
      %41 = arith.negf %40 : vector<8x128xf32>
      %42 = math.exp %41 : vector<8x128xf32>
      %cst_41 = arith.constant 1.000000e+00 : f32
      %43 = vector.broadcast %cst_41 : f32 to vector<8x128xf32>
      %44 = arith.addf %43, %42 : vector<8x128xf32>
      %45 = arith.divf %43, %44 : vector<8x128xf32>
      %46 = vector.extract_strided_slice %39 {offsets = [0, 128], sizes = [8, 128], strides = [1, 1]} : vector<8x512xf32> to vector<8x128xf32>
      %47 = arith.negf %46 : vector<8x128xf32>
      %48 = math.exp %47 : vector<8x128xf32>
      %cst_42 = arith.constant 1.000000e+00 : f32
      %49 = vector.broadcast %cst_42 : f32 to vector<8x128xf32>
      %50 = arith.addf %49, %48 : vector<8x128xf32>
      %51 = arith.divf %49, %50 : vector<8x128xf32>
      %52 = vector.extract_strided_slice %39 {offsets = [0, 256], sizes = [8, 128], strides = [1, 1]} : vector<8x512xf32> to vector<8x128xf32>
      %53 = math.tanh %52 : vector<8x128xf32>
      %54 = vector.extract_strided_slice %39 {offsets = [0, 384], sizes = [8, 128], strides = [1, 1]} : vector<8x512xf32> to vector<8x128xf32>
      %55 = arith.negf %54 : vector<8x128xf32>
      %56 = math.exp %55 : vector<8x128xf32>
      %cst_43 = arith.constant 1.000000e+00 : f32
      %57 = vector.broadcast %cst_43 : f32 to vector<8x128xf32>
      %58 = arith.addf %57, %56 : vector<8x128xf32>
      %59 = arith.divf %57, %58 : vector<8x128xf32>
      %60 = arith.mulf %51, %arg12 : vector<8x128xf32>
      %61 = arith.mulf %45, %53 : vector<8x128xf32>
      %62 = arith.addf %60, %61 : vector<8x128xf32>
      %63 = math.tanh %62 : vector<8x128xf32>
      %64 = arith.mulf %59, %63 : vector<8x128xf32>
      %65 = arith.truncf %64 : vector<8x128xf32> to vector<8x128xbf16>
      %66 = arith.index_cast %arg10 : i32 to index
      %c0_44 = arith.constant 0 : index
      %c0_45 = arith.constant 0 : index
      %67 = vector.load %arg9[%66, %c0_44, %c0_45] : memref<8x8x128xbf16, #tpu.memory_space<vmem>>, vector<1x8x128xbf16>
      %68 = vector.shape_cast %67 : vector<1x8x128xbf16> to vector<8x128xbf16>
      %69 = vector.shape_cast %65 : vector<8x128xbf16> to vector<1x8x128xbf16>
      tpu.vector_store %arg9[%66, %c0_44, %c0_45], %69 {strides = array<i32>} : memref<8x8x128xbf16, #tpu.memory_space<vmem>>, vector<1x8x128xbf16>,
      scf.yield %64, %62 : vector<8x128xf32>, vector<8x128xf32>
    }
    %c8_i32_11 = arith.constant 8 : i32
    %c0_12 = arith.constant 0 : index
    %c0_13 = arith.constant 0 : index
    %c0_14 = arith.constant 0 : index
    %10 = vector.load %arg7[%c0_12, %c0_13, %c0_14] : memref<2x8x128xf32, #tpu.memory_space<vmem>>, vector<1x8x128xf32>
    %11 = vector.shape_cast %10 : vector<1x8x128xf32> to vector<8x128xf32>
    %12 = vector.shape_cast %9#0 : vector<8x128xf32> to vector<1x8x128xf32>
    tpu.vector_store %arg7[%c0_12, %c0_13, %c0_14], %12 {strides = array<i32>} : memref<2x8x128xf32, #tpu.memory_space<vmem>>, vector<1x8x128xf32>,
    %c0_15 = arith.constant 0 : index
    %c0_16 = arith.constant 0 : index
    %c0_17 = arith.constant 0 : index
    %13 = vector.load %arg8[%c0_15, %c0_16, %c0_17] : memref<2x8x128xf32, #tpu.memory_space<vmem>>, vector<1x8x128xf32>
    %14 = vector.shape_cast %13 : vector<1x8x128xf32> to vector<8x128xf32>
    %15 = vector.shape_cast %9#1 : vector<8x128xf32> to vector<1x8x128xf32>
    tpu.vector_store %arg8[%c0_15, %c0_16, %c0_17], %15 {strides = array<i32>} : memref<2x8x128xf32, #tpu.memory_space<vmem>>, vector<1x8x128xf32>,
    %c1 = arith.constant 1 : index
    %c0_18 = arith.constant 0 : index
    %c0_19 = arith.constant 0 : index
    %16 = vector.load %arg2[%c1, %c0_18, %c0_19] : memref<2x256x512xbf16, #tpu.memory_space<vmem>>, vector<1x256x512xbf16>
    %17 = vector.shape_cast %16 : vector<1x256x512xbf16> to vector<256x512xbf16>
    %c1_20 = arith.constant 1 : index
    %c0_21 = arith.constant 0 : index
    %c0_22 = arith.constant 0 : index
    %18 = vector.load %arg3[%c1_20, %c0_21, %c0_22] : memref<2x1x512xf32, #tpu.memory_space<vmem>>, vector<1x1x512xf32>
    %19 = vector.shape_cast %18 : vector<1x1x512xf32> to vector<1x512xf32>
    %c1_23 = arith.constant 1 : index
    %c0_24 = arith.constant 0 : index
    %c0_25 = arith.constant 0 : index
    %20 = vector.load %arg4[%c1_23, %c0_24, %c0_25] : memref<2x8x128xf32, #tpu.memory_space<vmem>>, vector<1x8x128xf32>
    %21 = vector.shape_cast %20 : vector<1x8x128xf32> to vector<8x128xf32>
    %c1_26 = arith.constant 1 : index
    %c0_27 = arith.constant 0 : index
    %c0_28 = arith.constant 0 : index
    %22 = vector.load %arg5[%c1_26, %c0_27, %c0_28] : memref<2x8x128xf32, #tpu.memory_space<vmem>>, vector<1x8x128xf32>
    %23 = vector.shape_cast %22 : vector<1x8x128xf32> to vector<8x128xf32>
    %c0_i32_29 = arith.constant 0 : i32
    %c8_i32_30 = arith.constant 8 : i32
    %24 = arith.addi %c0_i32_29, %c8_i32_30 : i32
    %c1_i32_31 = arith.constant 1 : i32
    %25:2 = scf.for %arg10 = %c0_i32_29 to %24 step %c1_i32_31 iter_args(%arg11 = %21, %arg12 = %23) -> (vector<8x128xf32>, vector<8x128xf32>)  : i32 {
      %32 = arith.index_cast %arg10 : i32 to index
      %c0_39 = arith.constant 0 : index
      %c0_40 = arith.constant 0 : index
      %33 = vector.load %arg9[%32, %c0_39, %c0_40] : memref<8x8x128xbf16, #tpu.memory_space<vmem>>, vector<1x8x128xbf16>
      %34 = vector.shape_cast %33 : vector<1x8x128xbf16> to vector<8x128xbf16>
      %35 = arith.truncf %arg11 : vector<8x128xf32> to vector<8x128xbf16>
      %36 = tpu.concatenate %34, %35 in 1 : vector<8x128xbf16>, vector<8x128xbf16> -> vector<8x256xbf16>
      %cst = arith.constant dense<0.000000e+00> : vector<8x512xf32>
      %37 = tpu.matmul %36, %17, %cst {dimension_numbers = #tpu.dot_dimension_numbers<[1], [0], [0], [1], [0, 0, 1, 1], [], []>} : vector<8x256xbf16>, vector<256x512xbf16>, vector<8x512xf32> -> vector<8x512xf32>
      %38 = vector.broadcast %19 : vector<1x512xf32> to vector<8x512xf32>
      %39 = arith.addf %37, %38 : vector<8x512xf32>
      %40 = vector.extract_strided_slice %39 {offsets = [0, 0], sizes = [8, 128], strides = [1, 1]} : vector<8x512xf32> to vector<8x128xf32>
      %41 = arith.negf %40 : vector<8x128xf32>
      %42 = math.exp %41 : vector<8x128xf32>
      %cst_41 = arith.constant 1.000000e+00 : f32
      %43 = vector.broadcast %cst_41 : f32 to vector<8x128xf32>
      %44 = arith.addf %43, %42 : vector<8x128xf32>
      %45 = arith.divf %43, %44 : vector<8x128xf32>
      %46 = vector.extract_strided_slice %39 {offsets = [0, 128], sizes = [8, 128], strides = [1, 1]} : vector<8x512xf32> to vector<8x128xf32>
      %47 = arith.negf %46 : vector<8x128xf32>
      %48 = math.exp %47 : vector<8x128xf32>
      %cst_42 = arith.constant 1.000000e+00 : f32
      %49 = vector.broadcast %cst_42 : f32 to vector<8x128xf32>
      %50 = arith.addf %49, %48 : vector<8x128xf32>
      %51 = arith.divf %49, %50 : vector<8x128xf32>
      %52 = vector.extract_strided_slice %39 {offsets = [0, 256], sizes = [8, 128], strides = [1, 1]} : vector<8x512xf32> to vector<8x128xf32>
      %53 = math.tanh %52 : vector<8x128xf32>
      %54 = vector.extract_strided_slice %39 {offsets = [0, 384], sizes = [8, 128], strides = [1, 1]} : vector<8x512xf32> to vector<8x128xf32>
      %55 = arith.negf %54 : vector<8x128xf32>
      %56 = math.exp %55 : vector<8x128xf32>
      %cst_43 = arith.constant 1.000000e+00 : f32
      %57 = vector.broadcast %cst_43 : f32 to vector<8x128xf32>
      %58 = arith.addf %57, %56 : vector<8x128xf32>
      %59 = arith.divf %57, %58 : vector<8x128xf32>
      %60 = arith.mulf %51, %arg12 : vector<8x128xf32>
      %61 = arith.mulf %45, %53 : vector<8x128xf32>
      %62 = arith.addf %60, %61 : vector<8x128xf32>
      %63 = math.tanh %62 : vector<8x128xf32>
      %64 = arith.mulf %59, %63 : vector<8x128xf32>
      %65 = arith.truncf %64 : vector<8x128xf32> to vector<8x128xbf16>
      %66 = arith.index_cast %arg10 : i32 to index
      %c0_44 = arith.constant 0 : index
      %c0_45 = arith.constant 0 : index
      %67 = vector.load %arg6[%66, %c0_44, %c0_45] : memref<8x8x128xbf16, #tpu.memory_space<vmem>>, vector<1x8x128xbf16>
      %68 = vector.shape_cast %67 : vector<1x8x128xbf16> to vector<8x128xbf16>
      %69 = vector.shape_cast %65 : vector<8x128xbf16> to vector<1x8x128xbf16>
      tpu.vector_store %arg6[%66, %c0_44, %c0_45], %69 {strides = array<i32>} : memref<8x8x128xbf16, #tpu.memory_space<vmem>>, vector<1x8x128xbf16>,
      scf.yield %64, %62 : vector<8x128xf32>, vector<8x128xf32>
    }
    %c8_i32_32 = arith.constant 8 : i32
    %c1_33 = arith.constant 1 : index
    %c0_34 = arith.constant 0 : index
    %c0_35 = arith.constant 0 : index
    %26 = vector.load %arg7[%c1_33, %c0_34, %c0_35] : memref<2x8x128xf32, #tpu.memory_space<vmem>>, vector<1x8x128xf32>
    %27 = vector.shape_cast %26 : vector<1x8x128xf32> to vector<8x128xf32>
    %28 = vector.shape_cast %25#0 : vector<8x128xf32> to vector<1x8x128xf32>
    tpu.vector_store %arg7[%c1_33, %c0_34, %c0_35], %28 {strides = array<i32>} : memref<2x8x128xf32, #tpu.memory_space<vmem>>, vector<1x8x128xf32>,
    %c1_36 = arith.constant 1 : index
    %c0_37 = arith.constant 0 : index
    %c0_38 = arith.constant 0 : index
    %29 = vector.load %arg8[%c1_36, %c0_37, %c0_38] : memref<2x8x128xf32, #tpu.memory_space<vmem>>, vector<1x8x128xf32>
    %30 = vector.shape_cast %29 : vector<1x8x128xf32> to vector<8x128xf32>
    %31 = vector.shape_cast %25#1 : vector<8x128xf32> to vector<1x8x128xf32>
    tpu.vector_store %arg8[%c1_36, %c0_37, %c0_38], %31 {strides = array<i32>} : memref<2x8x128xf32, #tpu.memory_space<vmem>>, vector<1x8x128xf32>,
    return
  }
  func.func @transform_0(%arg0: i32) -> (i32, i32, i32) {
    %c0_i32 = arith.constant 0 : i32
    %c0_i32_0 = arith.constant 0 : i32
    %c0_i32_1 = arith.constant 0 : i32
    %c0_i32_2 = arith.constant 0 : i32
    return %c0_i32, %c0_i32_0, %c0_i32_1 : i32, i32, i32
  }
  func.func @transform_1(%arg0: i32) -> (i32, i32, i32) {
    %c0_i32 = arith.constant 0 : i32
    %c0_i32_0 = arith.constant 0 : i32
    %c0_i32_1 = arith.constant 0 : i32
    %c0_i32_2 = arith.constant 0 : i32
    return %c0_i32, %c0_i32_0, %c0_i32_1 : i32, i32, i32
  }
  func.func @transform_2(%arg0: i32) -> (i32, i32, i32) {
    %c0_i32 = arith.constant 0 : i32
    %c0_i32_0 = arith.constant 0 : i32
    %c0_i32_1 = arith.constant 0 : i32
    %c0_i32_2 = arith.constant 0 : i32
    return %c0_i32, %c0_i32_0, %c0_i32_1 : i32, i32, i32
  }
  func.func @transform_3(%arg0: i32) -> (i32, i32, i32) {
    %c0_i32 = arith.constant 0 : i32
    %c0_i32_0 = arith.constant 0 : i32
    %c0_i32_1 = arith.constant 0 : i32
    %c0_i32_2 = arith.constant 0 : i32
    return %c0_i32, %c0_i32_0, %c0_i32_1 : i32, i32, i32
  }
  func.func @transform_4(%arg0: i32) -> (i32, i32, i32) {
    %c0_i32 = arith.constant 0 : i32
    %c0_i32_0 = arith.constant 0 : i32
    %c0_i32_1 = arith.constant 0 : i32
    %c0_i32_2 = arith.constant 0 : i32
    return %c0_i32, %c0_i32_0, %c0_i32_1 : i32, i32, i32
  }
  func.func @transform_5(%arg0: i32) -> (i32, i32, i32) {
    %c0_i32 = arith.constant 0 : i32
    %c0_i32_0 = arith.constant 0 : i32
    %c0_i32_1 = arith.constant 0 : i32
    %c0_i32_2 = arith.constant 0 : i32
    return %c0_i32, %c0_i32_0, %c0_i32_1 : i32, i32, i32
  }
  func.func @transform_6(%arg0: i32) -> (i32, i32, i32) {
    %c0_i32 = arith.constant 0 : i32
    %c0_i32_0 = arith.constant 0 : i32
    %c0_i32_1 = arith.constant 0 : i32
    %c0_i32_2 = arith.constant 0 : i32
    return %c0_i32, %c0_i32_0, %c0_i32_1 : i32, i32, i32
  }
  func.func @transform_7(%arg0: i32) -> (i32, i32, i32) {
    %c0_i32 = arith.constant 0 : i32
    %c0_i32_0 = arith.constant 0 : i32
    %c0_i32_1 = arith.constant 0 : i32
    %c0_i32_2 = arith.constant 0 : i32
    return %c0_i32, %c0_i32_0, %c0_i32_1 : i32, i32, i32
  }
}

</mosaic_0001>

<bundles_post_ra>
// kernel: rnn_model_forward.3
= control target key start
LH: loop header
LB: loop body
LE: loop exit
PB: predicated region body
PF: predicated region fallthrough
CT: control target
= control target key end

     0   :  { %s499_s1 = inlined_call_operand.vmem [shape: bf16[128,128], index: 1, kind: input, shape index: {}]   ;;  %s500_s0 = inlined_call_operand.vmem [shape: bf16[64,128], index: 0, kind: input, shape index: {}]   ;;  %s501_s2 = inlined_call_operand.vmem [shape: f32[1,128], index: 2, kind: input, shape index: {}]   ;;  %s502_s3 = inlined_call_operand.vmem [shape: f32[64,128], index: 3, kind: output, shape index: {}]  }
   0x1   :  { %v340_v0 = vld [vmem:[%s499_s1] sm:$0xff]   ;;  %v341_v1 = vld [vmem:[%s499_s1 + $0x8] sm:$0xff]   ;;  %v342_v2 = vld [vmem:[%s499_s1 + $0x10] sm:$0xff]  }
   0x2   :  { %300 = vmatprep.subr.bf16.mxu0 %v340_v0  ;;  %324 = vmatprep.subr.bf16.mxu1 %v340_v0  ;;  %v343_v3 = vld [vmem:[%s499_s1 + $0x18] sm:$0xff]   ;;  %v348_v4 = vld [vmem:[%s500_s0] sm:$0xff]   ;;  %v350_v5 = vld [vmem:[%s500_s0 + $0x10] sm:$0xff]  }
   0x3   :  { %301 = vmatpush3.bf16.msra.mxu0 %v340_v0  ;;  %332 = vmatpush3.bf16.msra.mxu1 %v340_v0  ;;  %v344_v6 = vld [vmem:[%s499_s1 + $0x20] sm:$0xff]   ;;  %v345_v7 = vld [vmem:[%s499_s1 + $0x28] sm:$0xff]   ;;  %v346_v8 = vld [vmem:[%s499_s1 + $0x30] sm:$0xff]  }
   0x4   :  { %302 = vmatprep.subr.bf16.mxu0 %v341_v1  ;;  %325 = vmatprep.subr.bf16.mxu1 %v341_v1  ;;  %v347_v9 = vld [vmem:[%s499_s1 + $0x38] sm:$0xff]   ;;  %v349_v10 = vld [vmem:[%s500_s0 + $0x8] sm:$0xff]   ;;  %v275_v12 = vld [vmem:[%s501_s2] ss:$0 sm:$0xff] }
   0x5   :  { %316 = vmatprep.mubr.bf16.mxu0 %v348_v4  ;;  %320 = vmatprep.mubr.bf16.mxu1 %v350_v5  ;;  %v351_v11 = vld [vmem:[%s500_s0 + $0x18] sm:$0xff]  }
   0x7   :  { %303 = vmatpush3.bf16.msra.mxu0 %v341_v1  ;;  %333 = vmatpush3.bf16.msra.mxu1 %v341_v1 }
   0x8   :  { %304 = vmatprep.subr.bf16.mxu0 %v342_v2  ;;  %326 = vmatprep.subr.bf16.mxu1 %v342_v2 }
   0xb   :  { %305 = vmatpush3.bf16.msra.mxu0 %v342_v2  ;;  %334 = vmatpush3.bf16.msra.mxu1 %v342_v2 }
   0xc   :  { %306 = vmatprep.subr.bf16.mxu0 %v343_v3  ;;  %327 = vmatprep.subr.bf16.mxu1 %v343_v3 }
   0xf   :  { %307 = vmatpush3.bf16.msra.mxu0 %v343_v3  ;;  %335 = vmatpush3.bf16.msra.mxu1 %v343_v3 }
  0x10   :  { %308 = vmatprep.subr.bf16.mxu0 %v344_v6  ;;  %328 = vmatprep.subr.bf16.mxu1 %v344_v6 }
  0x13   :  { %309 = vmatpush3.bf16.msra.mxu0 %v344_v6  ;;  %336 = vmatpush3.bf16.msra.mxu1 %v344_v6 }
  0x14   :  { %310 = vmatprep.subr.bf16.mxu0 %v345_v7  ;;  %329 = vmatprep.subr.bf16.mxu1 %v345_v7 }
  0x17   :  { %311 = vmatpush3.bf16.msra.mxu0 %v345_v7  ;;  %337 = vmatpush3.bf16.msra.mxu1 %v345_v7 }
  0x18   :  { %312 = vmatprep.subr.bf16.mxu0 %v346_v8  ;;  %330 = vmatprep.subr.bf16.mxu1 %v346_v8 }
  0x1b   :  { %313 = vmatpush3.bf16.msra.mxu0 %v346_v8  ;;  %338 = vmatpush3.bf16.msra.mxu1 %v346_v8 }
  0x1c   :  { %314 = vmatprep.subr.bf16.mxu0 %v347_v9  ;;  %331 = vmatprep.subr.bf16.mxu1 %v347_v9 }
  0x1f   :  { %315 = vmatpush3.bf16.msra.mxu0 %v347_v9  ;;  %339 = vmatpush3.bf16.msra.mxu1 %v347_v9 }
  0x22   :  { %317 = vmatmul.mubr.bf16.vlgmr.msra.gmra.mrb[0].mxu0 %v349_v10  ;;  %321 = vmatmul.mubr.bf16.vlgmr.msra.gmra.mrb[0].mxu1 %v351_v11 }
  0xf5   :  { %v318_v13 = vpop.f32.mrb[0].mxu0  ;;  %v322_v14 = vpop.f32.mrb[0].mxu1 }
  0xf6   :  { %v161_v15 = vadd.f32 %v318_v13, %v275_v12  ;;  %v152_v16 = vpop.f32.mrb[1].mxu0  ;;  %v168_v17 = vpop.f32.mrb[1].mxu1  ;;  %v177_v28 = vadd.f32 %v322_v14, %v275_v12 }
  0xf7   :  { %v153_v18 = vadd.f32 %v275_v12, %v152_v16  ;;  %v319_v19 = vpop.f32.mrb[2].mxu0  ;;  %v323_v20 = vpop.f32.mrb[2].mxu1  ;;  %v169_v23 = vadd.f32 %v275_v12, %v168_v17 }
  0xf8   :  { %187 = vmax.xlane.f32.xlu1 %v161_v15  ;;  %v155_v21 = vpop.f32.mrb[3].mxu0  ;;  %v171_v22 = vpop.f32.mrb[3].mxu1  ;;  %v164_v24 = vadd.f32 %v319_v19, %v275_v12  ;;  %v180_v27 = vadd.f32 %v323_v20, %v275_v12 }
  0xf9   :  { %183 = vmax.xlane.f32.xlu0 %v153_v18  ;;  %v172_v25 = vadd.f32 %v275_v12, %v171_v22  ;;  %v156_v26 = vadd.f32 %v275_v12, %v155_v21 }
  0xfc   :  { %189 = vmax.xlane.f32.xlu1 %v164_v24 }
  0xfd   :  { %191 = vmax.xlane.f32.xlu0 %v169_v23 }
 0x100   :  { %193 = vmax.xlane.f32.xlu1 %v172_v25 }
 0x101   :  { %185 = vmax.xlane.f32.xlu0 %v156_v26 }
 0x104   :  { %197 = vmax.xlane.f32.xlu1 %v180_v27 }
 0x105   :  { %195 = vmax.xlane.f32.xlu0 %v177_v28 }
 0x185   :  { %v188_v29 = vpop.xlane.xlu1 %187 }
 0x186   :  { %v443_v30 = vsub.f32 %v161_v15, %v188_v29  ;;  %v184_v31 = vpop.xlane.xlu0 %183 }
 0x187   :  { %v445_v32 = vsub.f32 %v153_v18, %v184_v31 }
 0x188   :  { %v211_v33 = vmul.f32 1.442695, %v443_v30 }
 0x189   :  { %v207_v34 = vmul.f32 1.442695, %v445_v32  ;;  %v190_v35 = vpop.xlane.xlu1 %189 }
 0x18a   :  { %352 = vpow2.f32 %v211_v33  ;;  %v449_v36 = vsub.f32 %v164_v24, %v190_v35  ;;  %v192_v37 = vpop.xlane.xlu0 %191 }
 0x18b   :  { %v451_v38 = vsub.f32 %v169_v23, %v192_v37  ;;  %354 = vpow2.f32 %v207_v34 }
 0x18c   :  { %v213_v39 = vmul.f32 1.442695, %v449_v36 }
 0x18d   :  { %v194_v40 = vpop.xlane.xlu1 %193  ;;  %v215_v41 = vmul.f32 1.442695, %v451_v38 }
 0x18e   :  { %356 = vpow2.f32 %v213_v39  ;;  %v455_v42 = vsub.f32 %v172_v25, %v194_v40  ;;  %v186_v43 = vpop.xlane.xlu0 %185 }
 0x18f   :  { %v457_v44 = vsub.f32 %v156_v26, %v186_v43  ;;  %358 = vpow2.f32 %v215_v41 }
 0x190   :  { %v217_v47 = vmul.f32 1.442695, %v455_v42 }
 0x191   :  { %v209_v45 = vmul.f32 1.442695, %v457_v44  ;;  %v198_v46 = vpop.xlane.xlu1 %197 }
 0x192   :  { %v196_v48 = vpop.xlane.xlu0 %195  ;;  %v461_v49 = vsub.f32 %v180_v27, %v198_v46 }
 0x193   :  { %360 = vpow2.f32 %v209_v45  ;;  %v463_v50 = vsub.f32 %v177_v28, %v196_v48 }
 0x194   :  { %v353_v51 = vpop.eup %352  ;;  %362 = vpow2.f32 %v217_v47  ;;  %v221_v54 = vmul.f32 1.442695, %v461_v49 }
 0x195   :  { %v219_v52 = vmul.f32 1.442695, %v463_v50  ;;  %227 = vadd.xlane.f32.xlu0 %v353_v51  ;;  %v355_v53 = vpop.eup %354 }
 0x197   :  { %364 = vpow2.f32 %v219_v52 }
 0x198   :  { %v357_v55 = vpop.eup %356  ;;  %366 = vpow2.f32 %v221_v54 }
 0x199   :  { %229 = vadd.xlane.f32.xlu1 %v357_v55  ;;  %223 = vadd.xlane.f32.xlu0 %v355_v53  ;;  %v359_v56 = vpop.eup %358 }
 0x19d   :  { %v361_v57 = vpop.eup %360  ;;  %231 = vadd.xlane.f32.xlu0 %v359_v56 }
 0x19e   :  { %225 = vadd.xlane.f32.xlu1 %v361_v57  ;;  %v363_v58 = vpop.eup %362 }
 0x1a1   :  { %v365_v59 = vpop.eup %364 }
 0x1a2   :  { %233 = vadd.xlane.f32.xlu1 %v363_v58  ;;  %235 = vadd.xlane.f32.xlu0 %v365_v59  ;;  %v367_v60 = vpop.eup %366 }
 0x1a6   :  { %237 = vadd.xlane.f32.xlu1 %v367_v60 }
 0x222   :  { %v228_v61 = vpop.xlane.xlu0 %227 }
 0x223   :  { %368 = vlog2.f32 %v228_v61 }
 0x226   :  { %v230_v62 = vpop.xlane.xlu1 %229  ;;  %v224_v63 = vpop.xlane.xlu0 %223 }
 0x227   :  { %370 = vlog2.f32 %v230_v62 }
 0x228   :  { %372 = vlog2.f32 %v224_v63 }
 0x22a   :  { %v232_v0 = vpop.xlane.xlu0 %231 }
 0x22b   :  { %374 = vlog2.f32 %v232_v0  ;;  %v226_v1 = vpop.xlane.xlu1 %225 }
 0x22c   :  { %376 = vlog2.f32 %v226_v1 }
 0x22d   :  { %v369_v2 = vpop.eup %368 }
 0x22e   :  { %v244_v3 = vmul.f32 0.6931472, %v369_v2 }
 0x22f   :  { %v234_v4 = vpop.xlane.xlu1 %233  ;;  %v236_v5 = vpop.xlane.xlu0 %235 }
 0x230   :  { %v257_v6 = vsub.f32 %v443_v30, %v244_v3  ;;  %378 = vlog2.f32 %v234_v4 }
 0x231   :  { %v371_v7 = vpop.eup %370  ;;  %380 = vlog2.f32 %v236_v5 }
 0x232   :  { %v373_v8 = vpop.eup %372  ;;  %265 = vst [vmem:[%s502_s3 + $0x10] sm:$0xff] %v257_v6  ;;  %v246_v9 = vmul.f32 0.6931472, %v371_v7 }
 0x233   :  { %v240_v10 = vmul.f32 0.6931472, %v373_v8  ;;  %v238_v11 = vpop.xlane.xlu1 %237 }
 0x234   :  { %v258_v12 = vsub.f32 %v449_v36, %v246_v9  ;;  %382 = vlog2.f32 %v238_v11 }
 0x235   :  { %v375_v13 = vpop.eup %374  ;;  %v255_v14 = vsub.f32 %v445_v32, %v240_v10 }
 0x236   :  { %v377_v15 = vpop.eup %376  ;;  %266 = vst [vmem:[%s502_s3 + $0x18] sm:$0xff] %v258_v12  ;;  %v248_v16 = vmul.f32 0.6931472, %v375_v13 }
 0x237   :  { %263 = vst [vmem:[%s502_s3] sm:$0xff] %v255_v14  ;;  %v242_v17 = vmul.f32 0.6931472, %v377_v15 }
 0x238   :  { %v259_v18 = vsub.f32 %v451_v38, %v248_v16 }
 0x239   :  { %v256_v19 = vsub.f32 %v457_v44, %v242_v17 }
 0x23a   :  { %v379_v20 = vpop.eup %378  ;;  %267 = vst [vmem:[%s502_s3 + $0x20] sm:$0xff] %v259_v18 }
 0x23b   :  { %v381_v21 = vpop.eup %380  ;;  %264 = vst [vmem:[%s502_s3 + $0x8] sm:$0xff] %v256_v19  ;;  %v250_v22 = vmul.f32 0.6931472, %v379_v20 }
 0x23c   :  { %v252_v23 = vmul.f32 0.6931472, %v381_v21 }
 0x23d   :  { %v260_v24 = vsub.f32 %v455_v42, %v250_v22 }
 0x23e   :  { %v383_v25 = vpop.eup %382  ;;  %v261_v26 = vsub.f32 %v463_v50, %v252_v23 }
 0x23f   :  { %268 = vst [vmem:[%s502_s3 + $0x28] sm:$0xff] %v260_v24  ;;  %v254_v27 = vmul.f32 0.6931472, %v383_v25 }
 0x240   :  { %269 = vst [vmem:[%s502_s3 + $0x30] sm:$0xff] %v261_v26 }
 0x241   :  { %v262_v28 = vsub.f32 %v461_v49, %v254_v27 }
 0x243   :  { %270 = vst [vmem:[%s502_s3 + $0x38] sm:$0xff] %v262_v28 }

// kernel: rnn_model_forward.2
= control target key start
LH: loop header
LB: loop body
LE: loop exit
PB: predicated region body
PF: predicated region fallthrough
CT: control target
= control target key end

     0   :  { %13 = vsyncpa [#allocation4], 0  ;;  %s1448_s24 = smov [#allocation3]   ;;  %s2137_s0 = inlined_call_operand.vmem [shape: bf16[8,8,128], index: 0, kind: input, shape index: {}]   ;;  %s2138_s1 = inlined_call_operand.hbm [shape: bf16[2,256,512], index: 1, kind: input, shape index: {}]   ;;  %s2139_s2 = inlined_call_operand.vmem [shape: f32[2,1,512], index: 2, kind: input, shape index: {}]   ;;  %s2140_s3 = inlined_call_operand.vmem [shape: f32[2,8,128], index: 3, kind: input, shape index: {}]   ;;  %s2141_s4 = inlined_call_operand.vmem [shape: f32[2,8,128], index: 4, kind: input, shape index: {}]   ;;  %s2142_s5 = inlined_call_operand.vmem [shape: bf16[8,8,128], index: 5, kind: output, shape index: {0}]   ;;  %s2143_s6 = inlined_call_operand.vmem [shape: f32[2,8,128], index: 6, kind: output, shape index: {1}]   ;;  %s2144_s7 = inlined_call_operand.vmem [shape: f32[2,8,128], index: 7, kind: output, shape index: {2}]  }
   0x1   :  { %s21_s25 = sshll.u32 %s1448_s24, 4  ;;  %s1376_s28 = scalar_lea.hbm %s2138_s1, 16384  ;;  %s22_s25 = int_to_ptr.vmem [resolvable:$true] %s21_s25 }
   0x2   :  { %p1377_p0 = scmp.ne.s32.totalorder %s2138_s1, %s1376_s28  ;;  %p1380_p1 = scmp.lt.u32.totalorder %s1376_s28, %s2138_s1 }
   0x4   :  { %p1382_p2 = pnand %p1380_p1, %p1377_p0 }
   0x6   :  { %1385 = shalt.err (!%p1382_p2)
}
   0x7   :  { %s1386_s10 = scalar_lea.vmem %s22_s25, 16384  ;;  %p1391_p4 = scmp.lt.s32.totalorder %s22_s25, %s22_s25 }
   0x8   :  { %p1387_p3 = scmp.ne.s32.totalorder %s22_s25, %s1386_s10  ;;  %p1392_p5 = scmp.lt.s32.totalorder %s1386_s10, %s1386_s10 }
   0xa   :  { %p1393_p6 = por %p1392_p5, %p1391_p4 }
   0xc   :  { %p1394_p7 = pnand %p1393_p6, %p1387_p3 }
   0xe   :  { %1397 = shalt.err (!%p1394_p7)
}
   0xf   :  { %s1449_s11 = smov 256   ;;  %s1450_s12 = smov 16  }
  0x10   :  { %27 = dma.hbm_to_vmem [thread:$0]  %s2138_s1, 16384, %s22_s25, [#allocation4], %s1449_s11, %s1449_s11, %s1450_s12  }
  0x11   :  { %1422 = dma.done.wait [#allocation4], 16384  }
  0x12   :  { %1423 = vsyncadd [#allocation4], 4294950912  ;;  %v1503_v0 = vld [vmem:[#allocation3] sm:$0xff]  ;;  %v1505_v1 = vld [vmem:[#allocation3 + $0x8] sm:$0xff]  ;;  %s1646_s20 = smov 0  }
  0x13   :  { %2209 = vst [vmem:[#allocation6_spill] sm:$0xff] %v1503_v0  ;;  %2210 = vst [vmem:[#allocation7_spill] sm:$0xff] %v1505_v1  ;;  %v1507_v2 = vld [vmem:[#allocation3 + $0x10] sm:$0xff]  ;;  %v1509_v3 = vld [vmem:[#allocation3 + $0x18] sm:$0xff] }
  0x14   :  { %2211 = vst [vmem:[#allocation8_spill] sm:$0xff] %v1507_v2  ;;  %2212 = vst [vmem:[#allocation9_spill] sm:$0xff] %v1509_v3  ;;  %v1511_v4 = vld [vmem:[#allocation3 + $0x20] sm:$0xff]  ;;  %v1513_v5 = vld [vmem:[#allocation3 + $0x28] sm:$0xff] }
  0x15   :  { %2213 = vst [vmem:[#allocation10_spill] sm:$0xff] %v1511_v4  ;;  %2214 = vst [vmem:[#allocation11_spill] sm:$0xff] %v1513_v5  ;;  %v1515_v6 = vld [vmem:[#allocation3 + $0x30] sm:$0xff]  ;;  %v1517_v7 = vld [vmem:[#allocation3 + $0x38] sm:$0xff] }
  0x16   :  { %2215 = vst [vmem:[#allocation12_spill] sm:$0xff] %v1515_v6  ;;  %2216 = vst [vmem:[#allocation13_spill] sm:$0xff] %v1517_v7  ;;  %v1519_v8 = vld [vmem:[#allocation3 + $0x40] sm:$0xff]  ;;  %v1521_v9 = vld [vmem:[#allocation3 + $0x48] sm:$0xff] }
  0x17   :  { %2217 = vst [vmem:[#allocation14_spill] sm:$0xff] %v1519_v8  ;;  %2218 = vst [vmem:[#allocation15_spill] sm:$0xff] %v1521_v9  ;;  %v1523_v10 = vld [vmem:[#allocation3 + $0x50] sm:$0xff]  ;;  %v1525_v11 = vld [vmem:[#allocation3 + $0x58] sm:$0xff] }
  0x18   :  { %2219 = vst [vmem:[#allocation16_spill] sm:$0xff] %v1523_v10  ;;  %2220 = vst [vmem:[#allocation17_spill] sm:$0xff] %v1525_v11  ;;  %v1527_v12 = vld [vmem:[#allocation3 + $0x60] sm:$0xff]  ;;  %v1529_v13 = vld [vmem:[#allocation3 + $0x68] sm:$0xff] }
  0x19   :  { %2221 = vst [vmem:[#allocation18_spill] sm:$0xff] %v1527_v12  ;;  %2222 = vst [vmem:[#allocation19_spill] sm:$0xff] %v1529_v13  ;;  %v1531_v14 = vld [vmem:[#allocation3 + $0x70] sm:$0xff]  ;;  %v1533_v15 = vld [vmem:[#allocation3 + $0x78] sm:$0xff] }
  0x1a   :  { %v1535_v16 = vld [vmem:[#allocation3 + $0x80] sm:$0xff]  ;;  %v1537_v17 = vld [vmem:[#allocation3 + $0x88] sm:$0xff]  ;;  %v1539_v18 = vld [vmem:[#allocation3 + $0x90] sm:$0xff] }
  0x1b   :  { %v1541_v19 = vld [vmem:[#allocation3 + $0x98] sm:$0xff]  ;;  %v1543_v20 = vld [vmem:[#allocation3 + $0xa0] sm:$0xff]  ;;  %v1545_v21 = vld [vmem:[#allocation3 + $0xa8] sm:$0xff] }
  0x1c   :  { %v1547_v22 = vld [vmem:[#allocation3 + $0xb0] sm:$0xff]  ;;  %v1549_v23 = vld [vmem:[#allocation3 + $0xb8] sm:$0xff]  ;;  %v1551_v24 = vld [vmem:[#allocation3 + $0xc0] sm:$0xff] }
  0x1d   :  { %v1553_v25 = vld [vmem:[#allocation3 + $0xc8] sm:$0xff]  ;;  %v1555_v26 = vld [vmem:[#allocation3 + $0xd0] sm:$0xff]  ;;  %v1557_v27 = vld [vmem:[#allocation3 + $0xd8] sm:$0xff] }
  0x1e   :  { %v1559_v28 = vld [vmem:[#allocation3 + $0xe0] sm:$0xff]  ;;  %v1561_v29 = vld [vmem:[#allocation3 + $0xe8] sm:$0xff]  ;;  %v1563_v30 = vld [vmem:[#allocation3 + $0xf0] sm:$0xff] }
  0x1f   :  { %v1565_v31 = vld [vmem:[#allocation3 + $0xf8] sm:$0xff]  ;;  %v1567_v32 = vld [vmem:[#allocation3 + $0x100] sm:$0xff]  ;;  %v1569_v33 = vld [vmem:[#allocation3 + $0x108] sm:$0xff] }
  0x20   :  { %v1571_v34 = vld [vmem:[#allocation3 + $0x110] sm:$0xff]  ;;  %v1573_v35 = vld [vmem:[#allocation3 + $0x118] sm:$0xff]  ;;  %v1575_v36 = vld [vmem:[#allocation3 + $0x120] sm:$0xff] }
  0x21   :  { %v1577_v37 = vld [vmem:[#allocation3 + $0x128] sm:$0xff]  ;;  %v1579_v38 = vld [vmem:[#allocation3 + $0x130] sm:$0xff]  ;;  %v1581_v39 = vld [vmem:[#allocation3 + $0x138] sm:$0xff] }
  0x22   :  { %v1583_v40 = vld [vmem:[#allocation3 + $0x140] sm:$0xff]  ;;  %v1585_v41 = vld [vmem:[#allocation3 + $0x148] sm:$0xff]  ;;  %v1587_v42 = vld [vmem:[#allocation3 + $0x150] sm:$0xff] }
  0x23   :  { %v1589_v43 = vld [vmem:[#allocation3 + $0x158] sm:$0xff]  ;;  %v1591_v44 = vld [vmem:[#allocation3 + $0x160] sm:$0xff]  ;;  %v1593_v45 = vld [vmem:[#allocation3 + $0x168] sm:$0xff] }
  0x24   :  { %v1595_v46 = vld [vmem:[#allocation3 + $0x170] sm:$0xff]  ;;  %v1597_v47 = vld [vmem:[#allocation3 + $0x178] sm:$0xff]  ;;  %v1599_v48 = vld [vmem:[#allocation3 + $0x180] sm:$0xff] }
  0x25   :  { %v1601_v49 = vld [vmem:[#allocation3 + $0x188] sm:$0xff]  ;;  %v1603_v50 = vld [vmem:[#allocation3 + $0x190] sm:$0xff]  ;;  %v1605_v51 = vld [vmem:[#allocation3 + $0x198] sm:$0xff] }
  0x26   :  { %v1607_v52 = vld [vmem:[#allocation3 + $0x1a0] sm:$0xff]  ;;  %v1609_v53 = vld [vmem:[#allocation3 + $0x1a8] sm:$0xff]  ;;  %v1611_v54 = vld [vmem:[#allocation3 + $0x1b0] sm:$0xff] }
  0x27   :  { %2223 = vst [vmem:[#allocation20_spill] sm:$0xff] %v1609_v53  ;;  %v1613_v55 = vld [vmem:[#allocation3 + $0x1b8] sm:$0xff]  ;;  %v1615_v56 = vld [vmem:[#allocation3 + $0x1c0] sm:$0xff]  ;;  %v1617_v57 = vld [vmem:[#allocation3 + $0x1c8] sm:$0xff] }
  0x28   :  { %2224 = vst [vmem:[#allocation21_spill] sm:$0xff] %v1615_v56  ;;  %2225 = vst [vmem:[#allocation22_spill] sm:$0xff] %v1617_v57  ;;  %v1619_v58 = vld [vmem:[#allocation3 + $0x1d0] sm:$0xff]  ;;  %v1621_v59 = vld [vmem:[#allocation3 + $0x1d8] sm:$0xff] }
  0x29   :  { %2226 = vst [vmem:[#allocation23_spill] sm:$0xff] %v1621_v59  ;;  %v1623_v60 = vld [vmem:[#allocation3 + $0x1e0] sm:$0xff]  ;;  %v1625_v61 = vld [vmem:[#allocation3 + $0x1e8] sm:$0xff]  ;;  %v1627_v62 = vld [vmem:[#allocation3 + $0x1f0] sm:$0xff] }
  0x2a   :  { %2227 = vst [vmem:[#allocation24_spill] sm:$0xff] %v1623_v60  ;;  %2228 = vst [vmem:[#allocation25_spill] sm:$0xff] %v1625_v61  ;;  %v1629_v63 = vld [vmem:[#allocation3 + $0x1f8] sm:$0xff]  ;;  %v1634_v53 = vld [vmem:[%s2139_s2] sm:$0xf] }
  0x2b   :  { %2229 = vst [vmem:[#allocation26_spill] sm:$0xff] %v1627_v62  ;;  %2230 = vst [vmem:[#allocation27_spill] sm:$0xff] %v1629_v63  ;;  %v102_v57 = vld [vmem:[%s2140_s3] sm:$0xff]  }
  0x2c   :  { %2231 = vst [vmem:[#allocation28_spill] sm:$0xff] %v1634_v53  ;;  %v103_v59 = vld [vmem:[%s2141_s4] sm:$0xff]  }
  0x2d LB: > { %v2232_v13 = vld [vmem:[#allocation19_spill] sm:$0xff]  ;;  %v2233_v12 = vld [vmem:[#allocation18_spill] sm:$0xff]  ;;  %v2234_v11 = vld [vmem:[#allocation17_spill] sm:$0xff]  ;;  %2246 = vst [vmem:[#allocation29_spill] sm:$0xff] %v1426_v59  ;;  %s1150_s21 = sshll.u32 %s1434_s20, 2  ;;  %s109_s20 = sadd.s32 1, %s1434_s20   ;;  %v1430_v57 = vphi %v102_v57, %v2262_v57   ;;  %v1426_v59 = vphi %v103_v59, %v2261_v59   ;;  %s1434_s20 = sphi %s1646_s20, %s109_s20  }
  0x2e   : > { %v2235_v10 = vld [vmem:[#allocation16_spill] sm:$0xff]  ;;  %v2236_v9 = vld [vmem:[#allocation15_spill] sm:$0xff]  ;;  %v2237_v8 = vld [vmem:[#allocation14_spill] sm:$0xff]  ;;  %s113_s24 = scalar_lea.vmem %s2137_s0, %s1150_s21  ;;  %s565_s25 = scalar_lea.vmem [#allocation2], %s1150_s21 }
  0x2f   : > { %v2238_v7 = vld [vmem:[#allocation13_spill] sm:$0xff]  ;;  %v2239_v6 = vld [vmem:[#allocation12_spill] sm:$0xff]  ;;  %v2240_v5 = vld [vmem:[#allocation11_spill] sm:$0xff]  ;;  %p106_p8 = scmp.ge.s32.totalorder %s109_s20, 8  }
  0x30   : > { %v2241_v4 = vld [vmem:[#allocation10_spill] sm:$0xff]  ;;  %v2242_v3 = vld [vmem:[#allocation9_spill] sm:$0xff]  ;;  %v2243_v1 = vld [vmem:[#allocation7_spill] sm:$0xff]  ;;  %v1158_v62 = vcombine.high %v2240_v5, %v2238_v7  ;;  %s1966_s12 = smov (%p106_p8), 0  }
  0x31   : > { %v2244_v2 = vld [vmem:[#allocation8_spill] sm:$0xff]  ;;  %v2245_v0 = vld [vmem:[#allocation6_spill] sm:$0xff]  ;;  %v1156_v63 = vcombine.high %v2241_v4, %v2239_v6  ;;  %v1154_v60 = vcombine.high %v2243_v1, %v2242_v3  ;;  %v1153_v59 = vcombine.low %v2243_v1, %v2242_v3  ;;  %v1155_v56 = vcombine.low %v2241_v4, %v2239_v6  ;;  %v2249_v1 = vld [vmem:[#allocation21_spill] sm:$0xff] }
  0x32   : > { %v1152_v53 = vcombine.high %v2245_v0, %v2244_v2  ;;  %v1151_v61 = vcombine.low %v2245_v0, %v2244_v2  ;;  %v1160_v0 = vcombine.high %v2237_v8, %v2235_v10  ;;  %v1157_v2 = vcombine.low %v2240_v5, %v2238_v7  ;;  %v2250_v3 = vld [vmem:[#allocation23_spill] sm:$0xff]  ;;  %v2254_v6 = vld [vmem:[#allocation24_spill] sm:$0xff] }
  0x33   : > { %498 = vmatprep.subr.bf16.mxu1 %v1154_v60  ;;  %v1164_v60 = vcombine.high %v2233_v12, %v1531_v14  ;;  %v2255_v7 = vld [vmem:[#allocation27_spill] sm:$0xff] }
  0x34   : > { %457 = vmatprep.subr.bf16.mxu0 %v1152_v53  ;;  %499 = vmatpush1.bf16.msra.mxu1 %v1153_v59  ;;  %v1162_v53 = vcombine.high %v2236_v9, %v2234_v11  ;;  %v1166_v59 = vcombine.high %v2232_v13, %v1533_v15 }
  0x35   : > { %458 = vmatpush1.bf16.msra.mxu0 %v1151_v61  ;;  %500 = vmatprep.subr.bf16.mxu1 %v1158_v62  ;;  %v1159_v61 = vcombine.low %v2237_v8, %v2235_v10  ;;  %v1163_v62 = vcombine.low %v2233_v12, %v1531_v14  ;;  %v2256_v8 = vld [vmem:[#allocation25_spill] sm:$0xff] }
  0x36   : > { %459 = vmatprep.subr.bf16.mxu0 %v1156_v63  ;;  %v1161_v63 = vcombine.low %v2236_v9, %v2234_v11  ;;  %v1837_v14 = vld [vmem:[#allocation3 + $0x238] sm:$0xff] (%p106_p8) }
  0x37   :  { %2268 = vst [vmem:[#allocation11_spill] sm:$0xff] (%p106_p8), %v1837_v14 }
  0x38   : > { %501 = vmatpush1.bf16.msra.mxu1 %v1157_v2  ;;  %v1170_v2 = vcombine.high %v1537_v17, %v1541_v19 }
  0x39   : > { %460 = vmatpush1.bf16.msra.mxu0 %v1155_v56  ;;  %502 = vmatprep.subr.bf16.mxu1 %v1162_v53  ;;  %v1168_v56 = vcombine.high %v1535_v16, %v1539_v18  ;;  %v1167_v53 = vcombine.low %v1535_v16, %v1539_v18  ;;  %v1841_v16 = vld [vmem:[#allocation3 + $0x248] sm:$0xff] (%p106_p8)  ;;  %v1847_v18 = vld [vmem:[#allocation3 + $0x260] sm:$0xff] (%p106_p8) }
  0x3a   : > { %461 = vmatprep.subr.bf16.mxu0 %v1160_v0  ;;  %v1165_v0 = vcombine.low %v2232_v13, %v1533_v15  ;;  %v1839_v15 = vld [vmem:[#allocation3 + $0x240] sm:$0xff] (%p106_p8)  ;;  %2270 = vst [vmem:[#allocation13_spill] sm:$0xff] (%p106_p8), %v1841_v16 }
  0x3b   :  { %2269 = vst [vmem:[#allocation12_spill] sm:$0xff] (%p106_p8), %v1839_v15 }
  0x3c   : > { %503 = vmatpush1.bf16.msra.mxu1 %v1161_v63  ;;  %v1169_v63 = vcombine.low %v1537_v17, %v1541_v19  ;;  %v1845_v17 = vld [vmem:[#allocation3 + $0x258] sm:$0xff] (%p106_p8)  ;;  %v1849_v19 = vld [vmem:[#allocation3 + $0x268] sm:$0xff] (%p106_p8) }
  0x3d   : > { %462 = vmatpush1.bf16.msra.mxu0 %v1159_v61  ;;  %504 = vmatprep.subr.bf16.mxu1 %v1166_v59  ;;  %v115_v61 = vpack.c.bf16 %v1430_v57, %v1430_v57  ;;  %v1174_v59 = vcombine.high %v1545_v21, %v1549_v23  ;;  %v1176_v57 = vcombine.high %v1551_v24, %v1555_v26 }
  0x3e   : > { %463 = vmatprep.subr.bf16.mxu0 %v1164_v60  ;;  %v1172_v60 = vcombine.high %v1543_v20, %v1547_v22  ;;  %2272 = vst [vmem:[#allocation15_spill] sm:$0xff] (%p106_p8), %v1845_v17 }
  0x3f   : > { %489 = vmatprep.mubr.bf16.mxu0 %v115_v61  ;;  %530 = vmatprep.mubr.bf16.mxu1 %v115_v61  ;;  %v1177_v61 = vcombine.low %v1553_v25, %v1557_v27 }
  0x40   : > { %505 = vmatpush1.bf16.msra.mxu1 %v1165_v0  ;;  %v1178_v0 = vcombine.high %v1553_v25, %v1557_v27  ;;  %v1861_v25 = vld [vmem:[#allocation3 + $0x298] sm:$0xff] (%p106_p8)  ;;  %v1865_v27 = vld [vmem:[#allocation3 + $0x2a8] sm:$0xff] (%p106_p8) }
  0x41   : > { %464 = vmatpush1.bf16.msra.mxu0 %v1163_v62  ;;  %506 = vmatprep.subr.bf16.mxu1 %v1170_v2  ;;  %v1171_v62 = vcombine.low %v1543_v20, %v1547_v22  ;;  %v1175_v2 = vcombine.low %v1551_v24, %v1555_v26  ;;  %v1851_v20 = vld [vmem:[#allocation3 + $0x270] sm:$0xff] (%p106_p8)  ;;  %v1855_v22 = vld [vmem:[#allocation3 + $0x280] sm:$0xff] (%p106_p8) }
  0x42   : > { %465 = vmatprep.subr.bf16.mxu0 %v1168_v56  ;;  %v1173_v56 = vcombine.low %v1545_v21, %v1549_v23  ;;  %v1853_v21 = vld [vmem:[#allocation3 + $0x278] sm:$0xff] (%p106_p8)  ;;  %v1857_v23 = vld [vmem:[#allocation3 + $0x288] sm:$0xff] (%p106_p8)  ;;  %v1859_v24 = vld [vmem:[#allocation3 + $0x290] sm:$0xff] (%p106_p8) }
  0x43   :  { %v1863_v26 = vld [vmem:[#allocation3 + $0x2a0] sm:$0xff] (%p106_p8) }
  0x44   : > { %507 = vmatpush1.bf16.msra.mxu1 %v1169_v63  ;;  %v1179_v63 = vcombine.low %v1559_v28, %v1563_v30 }
  0x45   : > { %466 = vmatpush1.bf16.msra.mxu0 %v1167_v53  ;;  %508 = vmatprep.subr.bf16.mxu1 %v1174_v59  ;;  %v1180_v53 = vcombine.high %v1559_v28, %v1563_v30  ;;  %v1184_v59 = vcombine.high %v1567_v32, %v1571_v34  ;;  %v1867_v28 = vld [vmem:[#allocation3 + $0x2b0] sm:$0xff] (%p106_p8)  ;;  %v1871_v30 = vld [vmem:[#allocation3 + $0x2c0] sm:$0xff] (%p106_p8) }
  0x46   : > { %467 = vmatprep.subr.bf16.mxu0 %v1172_v60  ;;  %v1182_v60 = vcombine.high %v1561_v29, %v1565_v31 }
  0x48   : > { %509 = vmatpush1.bf16.msra.mxu1 %v1173_v56  ;;  %v1183_v56 = vcombine.low %v1567_v32, %v1571_v34  ;;  %v1875_v32 = vld [vmem:[#allocation3 + $0x2d0] sm:$0xff] (%p106_p8)  ;;  %v1879_v34 = vld [vmem:[#allocation3 + $0x2e0] sm:$0xff] (%p106_p8) }
  0x49   : > { %468 = vmatpush1.bf16.msra.mxu0 %v1171_v62  ;;  %510 = vmatprep.subr.bf16.mxu1 %v1178_v0  ;;  %v1181_v62 = vcombine.low %v1561_v29, %v1565_v31  ;;  %v1188_v0 = vcombine.high %v1575_v36, %v1579_v38  ;;  %v1869_v29 = vld [vmem:[#allocation3 + $0x2b8] sm:$0xff] (%p106_p8)  ;;  %v1873_v31 = vld [vmem:[#allocation3 + $0x2c8] sm:$0xff] (%p106_p8) }
  0x4a   : > { %469 = vmatprep.subr.bf16.mxu0 %v1176_v57  ;;  %v1186_v57 = vcombine.high %v1569_v33, %v1573_v35 }
  0x4c   : > { %511 = vmatpush1.bf16.msra.mxu1 %v1177_v61  ;;  %v1187_v61 = vcombine.low %v1575_v36, %v1579_v38  ;;  %v1883_v36 = vld [vmem:[#allocation3 + $0x2f0] sm:$0xff] (%p106_p8)  ;;  %v1887_v38 = vld [vmem:[#allocation3 + $0x300] sm:$0xff] (%p106_p8) }
  0x4d   : > { %470 = vmatpush1.bf16.msra.mxu0 %v1175_v2  ;;  %512 = vmatprep.subr.bf16.mxu1 %v1182_v60  ;;  %v1185_v2 = vcombine.low %v1569_v33, %v1573_v35  ;;  %v1192_v60 = vcombine.high %v1583_v40, %v1587_v42  ;;  %v1877_v33 = vld [vmem:[#allocation3 + $0x2d8] sm:$0xff] (%p106_p8)  ;;  %v1881_v35 = vld [vmem:[#allocation3 + $0x2e8] sm:$0xff] (%p106_p8) }
  0x4e   : > { %471 = vmatprep.subr.bf16.mxu0 %v1180_v53  ;;  %v1190_v53 = vcombine.high %v1577_v37, %v1581_v39 }
  0x50   : > { %513 = vmatpush1.bf16.msra.mxu1 %v1181_v62  ;;  %v1191_v62 = vcombine.low %v1583_v40, %v1587_v42  ;;  %v1891_v40 = vld [vmem:[#allocation3 + $0x310] sm:$0xff] (%p106_p8)  ;;  %v1895_v42 = vld [vmem:[#allocation3 + $0x320] sm:$0xff] (%p106_p8) }
  0x51   : > { %472 = vmatpush1.bf16.msra.mxu0 %v1179_v63  ;;  %514 = vmatprep.subr.bf16.mxu1 %v1186_v57  ;;  %v1189_v63 = vcombine.low %v1577_v37, %v1581_v39  ;;  %v1196_v57 = vcombine.high %v1591_v44, %v1595_v46  ;;  %v1885_v37 = vld [vmem:[#allocation3 + $0x2f8] sm:$0xff] (%p106_p8)  ;;  %v1889_v39 = vld [vmem:[#allocation3 + $0x308] sm:$0xff] (%p106_p8) }
  0x52   : > { %473 = vmatprep.subr.bf16.mxu0 %v1184_v59  ;;  %v1194_v59 = vcombine.high %v1585_v41, %v1589_v43 }
  0x54   : > { %515 = vmatpush1.bf16.msra.mxu1 %v1185_v2  ;;  %v1195_v2 = vcombine.low %v1591_v44, %v1595_v46  ;;  %v1899_v44 = vld [vmem:[#allocation3 + $0x330] sm:$0xff] (%p106_p8)  ;;  %v1903_v46 = vld [vmem:[#allocation3 + $0x340] sm:$0xff] (%p106_p8) }
  0x55   : > { %474 = vmatpush1.bf16.msra.mxu0 %v1183_v56  ;;  %516 = vmatprep.subr.bf16.mxu1 %v1190_v53  ;;  %v1193_v56 = vcombine.low %v1585_v41, %v1589_v43  ;;  %v1200_v53 = vcombine.high %v1599_v48, %v1603_v50  ;;  %v1893_v41 = vld [vmem:[#allocation3 + $0x318] sm:$0xff] (%p106_p8)  ;;  %v1897_v43 = vld [vmem:[#allocation3 + $0x328] sm:$0xff] (%p106_p8) }
  0x56   : > { %475 = vmatprep.subr.bf16.mxu0 %v1188_v0  ;;  %v1198_v0 = vcombine.high %v1593_v45, %v1597_v47 }
  0x58   : > { %517 = vmatpush1.bf16.msra.mxu1 %v1189_v63  ;;  %v1199_v63 = vcombine.low %v1599_v48, %v1603_v50  ;;  %v1907_v48 = vld [vmem:[#allocation3 + $0x350] sm:$0xff] (%p106_p8)  ;;  %v1911_v50 = vld [vmem:[#allocation3 + $0x360] sm:$0xff] (%p106_p8) }
  0x59   : > { %476 = vmatpush1.bf16.msra.mxu0 %v1187_v61  ;;  %518 = vmatprep.subr.bf16.mxu1 %v1194_v59  ;;  %v1197_v61 = vcombine.low %v1593_v45, %v1597_v47  ;;  %v1204_v59 = vcombine.high %v1607_v52, %v1611_v54  ;;  %v1901_v45 = vld [vmem:[#allocation3 + $0x338] sm:$0xff] (%p106_p8)  ;;  %v1905_v47 = vld [vmem:[#allocation3 + $0x348] sm:$0xff] (%p106_p8) }
  0x5a   : > { %477 = vmatprep.subr.bf16.mxu0 %v1192_v60  ;;  %v1202_v60 = vcombine.high %v1601_v49, %v1605_v51 }
  0x5c   : > { %519 = vmatpush1.bf16.msra.mxu1 %v1193_v56 }
  0x5d   : > { %478 = vmatpush1.bf16.msra.mxu0 %v1191_v62  ;;  %520 = vmatprep.subr.bf16.mxu1 %v1198_v0  ;;  %v1201_v62 = vcombine.low %v1601_v49, %v1605_v51  ;;  %v1909_v49 = vld [vmem:[#allocation3 + $0x358] sm:$0xff] (%p106_p8)  ;;  %v1913_v51 = vld [vmem:[#allocation3 + $0x368] sm:$0xff] (%p106_p8) }
  0x5e   : > { %479 = vmatprep.subr.bf16.mxu0 %v1196_v57  ;;  %v2247_v57 = vld [vmem:[#allocation20_spill] sm:$0xff] }
  0x5f   : > { %v2248_v56 = vmov %v2247_v57  ;;  %v1206_v0 = vcombine.high %v2247_v57, %v1613_v55  ;;  %v2252_v57 = vld [vmem:[#allocation26_spill] sm:$0xff] }
  0x60   : > { %521 = vmatpush1.bf16.msra.mxu1 %v1197_v61  ;;  %v1205_v61 = vcombine.low %v2248_v56, %v1613_v55  ;;  %v2253_v5 = vmov %v2252_v57  ;;  %v1919_v55 = vld [vmem:[#allocation3 + $0x380] sm:$0xff] (%p106_p8)  ;;  %v1923_v56 = vld [vmem:[#allocation3 + $0x390] sm:$0xff] (%p106_p8) }
  0x61   : > { %480 = vmatpush1.bf16.msra.mxu0 %v1195_v2  ;;  %522 = vmatprep.subr.bf16.mxu1 %v1202_v60  ;;  %v1203_v2 = vcombine.low %v1607_v52, %v1611_v54  ;;  %v2251_v60 = vld [vmem:[#allocation22_spill] sm:$0xff]  ;;  %v1915_v52 = vld [vmem:[#allocation3 + $0x370] sm:$0xff] (%p106_p8)  ;;  %v1917_v54 = vld [vmem:[#allocation3 + $0x378] sm:$0xff] (%p106_p8) }
  0x62   : > { %481 = vmatprep.subr.bf16.mxu0 %v1200_v53  ;;  %v1208_v53 = vcombine.high %v2249_v1, %v1619_v58  ;;  %v1210_v4 = vcombine.high %v2251_v60, %v2250_v3 }
  0x64   : > { %523 = vmatpush1.bf16.msra.mxu1 %v1201_v62  ;;  %v1209_v62 = vcombine.low %v2251_v60, %v2250_v3  ;;  %v1925_v60 = vld [vmem:[#allocation3 + $0x398] sm:$0xff] (%p106_p8) }
  0x65   : > { %482 = vmatpush1.bf16.msra.mxu0 %v1199_v63  ;;  %524 = vmatprep.subr.bf16.mxu1 %v1206_v0  ;;  %v1207_v63 = vcombine.low %v2249_v1, %v1619_v58  ;;  %v1214_v0 = vcombine.high %v2256_v8, %v2255_v7  ;;  %v1921_v58 = vld [vmem:[#allocation3 + $0x388] sm:$0xff] (%p106_p8) }
  0x66   : > { %483 = vmatprep.subr.bf16.mxu0 %v1204_v59  ;;  %v1212_v59 = vcombine.high %v2254_v6, %v2252_v57  ;;  %v2258_v57 = vld [vmem:[#allocation28_spill] sm:$0xff] }
  0x68   : > { %525 = vmatpush1.bf16.msra.mxu1 %v1205_v61  ;;  %v117_v61 = vlaneseq }
  0x69   : > { %484 = vmatpush1.bf16.msra.mxu0 %v1203_v2  ;;  %526 = vmatprep.subr.bf16.mxu1 %v1210_v4  ;;  %v1211_v2 = vcombine.low %v2254_v6, %v2253_v5  ;;  %v114_v4 = vld [vmem:[%s113_s24] sm:$0xf]  ;;  %v2259_v5 = vmov %v2258_v57 }
  0x6a   : > { %485 = vmatprep.subr.bf16.mxu0 %v1208_v53  ;;  %v1213_v53 = vcombine.low %v2256_v8, %v2255_v7 }
  0x6c   : > { %527 = vmatpush1.bf16.msra.mxu1 %v1209_v62 }
  0x6d   : > { %486 = vmatpush1.bf16.msra.mxu0 %v1207_v63  ;;  %528 = vmatprep.subr.bf16.mxu1 %v1214_v0  ;;  %v1789_v63 = vshrl.u32 %v117_v61, 7 }
  0x6e   : > { %487 = vmatprep.subr.bf16.mxu0 %v1212_v59 }
  0x6f   : > { %2257 = vst [vmem:[#allocation30_spill] sm:$0xff] %v1789_v63  ;;  %v2172_v1 = vsub.s32 0, %v1789_v63  ;;  %v2174_v3 = vsub.s32 1, %v1789_v63  ;;  %v2176_v0 = vsub.s32 3, %v1789_v63  ;;  %v2177_v12 = vsub.s32 2, %v1789_v63  ;;  %v1949_v63 = vld [vmem:[#allocation3 + $0x3f8] sm:$0xff] (%p106_p8) }
  0x70   : > { %529 = vmatpush1.bf16.msra.mxu1 %v1213_v53  ;;  %2282 = vst [vmem:[#allocation25_spill] sm:$0xff] (%p106_p8), %v1949_v63 }
  0x71   : > { %488 = vmatpush1.bf16.msra.mxu0 %v1211_v2  ;;  %v120_v59 = vrot.slane %v2258_v57, %v2172_v1  ;;  %v124_v62 = vrot.slane %v2259_v5, %v2174_v3  ;;  %v132_v11 = vrot.slane %v2259_v5, %v2176_v0 }
  0x73   : > { %531 = vmatmul.mubr.bf16.vlgmr.msra.gmra.mrb[0].mxu1 %v114_v4 }
  0x74   : > { %490 = vmatmul.mubr.bf16.vlgmr.msra.gmra.mrb[0].mxu0 %v114_v4 }
 0x146   : > { %v532_v6 = vpop.f32.mrb[0].mxu1 }
 0x147   : > { %v491_v2 = vpop.f32.mrb[0].mxu0  ;;  %v534_v8 = vpop.f32.mrb[1].mxu1 }
 0x148   : > { %v492_v53 = vadd.f32 %v491_v2, %v120_v59  ;;  %v493_v4 = vpop.f32.mrb[1].mxu0  ;;  %v536_v57 = vpop.f32.mrb[2].mxu1  ;;  %v535_v13 = vadd.f32 %v534_v8, %v132_v11  ;;  %v128_v59 = vrot.slane %v2259_v5, %v2177_v12  ;;  %v1835_v5 = vld [vmem:[#allocation3 + $0x230] sm:$0xff] (%p106_p8) }
 0x149   : > { %v494_v61 = vadd.f32 %v493_v4, %v124_v62  ;;  %v495_v7 = vpop.f32.mrb[2].mxu0  ;;  %v537_v3 = vpop.f32.mrb[3].mxu1  ;;  %v2260_v57 = vld [vmem:[#allocation29_spill] sm:$0xff]  ;;  %2267 = vst [vmem:[#allocation10_spill] sm:$0xff] (%p106_p8), %v1835_v5 }
 0x14a   : > { %v1215_v9 = vmul.f32 -1.442695, %v492_v53  ;;  %v496_v10 = vpop.f32.mrb[3].mxu0  ;;  %v1217_v7 = vmul.f32 -1.442695, %v535_v13  ;;  %v533_v62 = vadd.f32 %v532_v6, %v128_v59 }
 0x14b   : > { %v1216_v1 = vmul.f32 -1.442695, %v494_v61 }
 0x14c   : > { %1344 = vpow2.f32 %v1215_v9 }
 0x14d   : > { %1346 = vpow2.f32 %v1216_v1 }
 0x14e   : > { %1348 = vpow2.f32 %v1217_v7 }
 0x14f   : > { %1350 = vtanh.f32 %v533_v62  ;;  %v1825_v62 = vld [vmem:[#allocation3 + $0x208] sm:$0xff] (%p106_p8) }
 0x156   : > { %v1345_v2 = vpop.eup %1344 }
 0x157   : > { %v1347_v10 = vpop.eup %1346  ;;  %v542_v53 = vadd.f32 1.0, %v1345_v2  ;;  %v1827_v2 = vld [vmem:[#allocation3 + $0x210] sm:$0xff] (%p106_p8) }
 0x158   : > { %v548_v4 = vadd.f32 1.0, %v1347_v10  ;;  %v1349_v61 = vpop.eup %1348  ;;  %2264 = vst [vmem:[#allocation7_spill] sm:$0xff] (%p106_p8), %v1827_v2  ;;  %v1829_v10 = vld [vmem:[#allocation3 + $0x218] sm:$0xff] (%p106_p8) }
 0x159   : > { %1352 = vrcp.f32 %v542_v53  ;;  %v1351_v3 = vpop.eup %1350  ;;  %v555_v1 = vadd.f32 1.0, %v1349_v61  ;;  %2265 = vst [vmem:[#allocation8_spill] sm:$0xff] (%p106_p8), %v1829_v10  ;;  %v1831_v53 = vld [vmem:[#allocation3 + $0x220] sm:$0xff] (%p106_p8) }
 0x15a   : > { %1354 = vrcp.f32 %v548_v4  ;;  %v1833_v4 = vld [vmem:[#allocation3 + $0x228] sm:$0xff] (%p106_p8)  ;;  %v1927_v61 = vld [vmem:[#allocation3 + $0x3a0] sm:$0xff] (%p106_p8) }
 0x15b   : > { %1356 = vrcp.f32 %v555_v1  ;;  %2266 = vst [vmem:[#allocation9_spill] sm:$0xff] (%p106_p8), %v1833_v4  ;;  %v1933_v1 = vld [vmem:[#allocation3 + $0x3b8] sm:$0xff] (%p106_p8) }
 0x15c   :  { %2275 = vst [vmem:[#allocation18_spill] sm:$0xff] (%p106_p8), %v1933_v1 }
 0x163   : > { %v1353_v9 = vpop.eup %1352 }
 0x164   : > { %v1355_v8 = vpop.eup %1354  ;;  %v559_v11 = vmul.f32 %v1353_v9, %v1351_v3  ;;  %v1929_v3 = vld [vmem:[#allocation3 + $0x3a8] sm:$0xff] (%p106_p8)  ;;  %v1931_v9 = vld [vmem:[#allocation3 + $0x3b0] sm:$0xff] (%p106_p8) }
 0x165   : > { %v558_v0 = vmul.f32 %v2260_v57, %v1355_v8  ;;  %v1357_v6 = vpop.eup %1356  ;;  %2273 = vst [vmem:[#allocation16_spill] sm:$0xff] (%p106_p8), %v1929_v3  ;;  %2274 = vst [vmem:[#allocation17_spill] sm:$0xff] (%p106_p8), %v1931_v9  ;;  %v1935_v8 = vld [vmem:[#allocation3 + $0x3c0] sm:$0xff] (%p106_p8) }
 0x166   :  { %2276 = vst [vmem:[#allocation19_spill] sm:$0xff] (%p106_p8), %v1935_v8  ;;  %v1954_v3 = vld [vmem:[%s2139_s2 + $0x4] sm:$0xf] (%p106_p8) }
 0x167   : > { %v560_v12 = vadd.f32 %v559_v11, %v558_v0   ;;  %v1823_v0 = vld [vmem:[#allocation3 + $0x200] sm:$0xff] (%p106_p8)  ;;  %v1937_v11 = vld [vmem:[#allocation3 + $0x3c8] sm:$0xff] (%p106_p8)  ;;  %2283 = vst [vmem:[#allocation26_spill] sm:$0xff] (%p106_p8), %v1954_v3 }
 0x168   :  { %2263 = vst [vmem:[#allocation6_spill] sm:$0xff] (%p106_p8), %v1823_v0  ;;  %2277 = vst [vmem:[#allocation20_spill] sm:$0xff] (%p106_p8), %v1937_v11  ;;  %v1220_v11 = vld [vmem:[%s2140_s3 + $0x8] sm:$0xff] (%p106_p8)  }
 0x169   : > { %1358 = vtanh.f32 %v560_v12  ;;  %568 = vst [vmem:[%s2144_s7] sm:$0xff] (%p106_p8), %v560_v12 }
 0x172   :  { %108 = sbr.rel (!%p106_p8) target bundleno = 45 (0x2d), region = 84 }
 0x173   : > { %v1359_v13 = vpop.eup %1358 }
 0x174   : > { %v562_v7 = vmul.f32 %v1359_v13, %v1357_v6   ;;  %v1941_v6 = vld [vmem:[#allocation3 + $0x3d8] sm:$0xff] (%p106_p8)  ;;  %v1943_v13 = vld [vmem:[#allocation3 + $0x3e0] sm:$0xff] (%p106_p8) }
 0x175   :  { %2278 = vst [vmem:[#allocation21_spill] sm:$0xff] (%p106_p8), %v1941_v6  ;;  %2279 = vst [vmem:[#allocation22_spill] sm:$0xff] (%p106_p8), %v1943_v13  ;;  %v1221_v6 = vld [vmem:[%s2141_s4 + $0x8] sm:$0xff] (%p106_p8)  }
 0x176   : > { %v563_v59 = vpack.c.bf16 %v562_v7, %v562_v7  ;;  %v2262_v57 = vmov %v562_v7  ;;  %567 = vst [vmem:[%s2143_s6] sm:$0xff] (%p106_p8), %v562_v7  ;;  %v1945_v7 = vld [vmem:[#allocation3 + $0x3e8] sm:$0xff] (%p106_p8) }
 0x177   :  { %v1939_v57 = vld [vmem:[#allocation3 + $0x3d0] sm:$0xff] (%p106_p8)  ;;  %2280 = vst [vmem:[#allocation23_spill] sm:$0xff] (%p106_p8), %v1945_v7 }
 0x178   : > { %566 = vst [vmem:[%s565_s25] sm:$0xf] %v563_v59  ;;  %v2261_v59 = vmov %v560_v12  ;;  %v1843_v12 = vld [vmem:[#allocation3 + $0x250] sm:$0xff] (%p106_p8) }
 0x179   :  { %2271 = vst [vmem:[#allocation14_spill] sm:$0xff] %v1843_v12  ;;  %v1947_v59 = vld [vmem:[#allocation3 + $0x3f0] sm:$0xff] }
 0x17a   :  { %2281 = vst [vmem:[#allocation24_spill] sm:$0xff] %v1947_v59 }
 0x17b LB: > { %v2284_v17 = vld [vmem:[#allocation15_spill] sm:$0xff]  ;;  %v2285_v16 = vld [vmem:[#allocation13_spill] sm:$0xff]  ;;  %v2286_v15 = vld [vmem:[#allocation12_spill] sm:$0xff]  ;;  %2296 = vst [vmem:[#allocation31_spill] sm:$0xff] %v1438_v6  ;;  %s1222_s2 = sshll.u32 %s1446_s12, 2  ;;  %s645_s12 = sadd.s32 1, %s1446_s12   ;;  %s1446_s12 = sphi %s1966_s12, %s645_s12   ;;  %v1442_v11 = vphi %v1220_v11, %v2315_v11   ;;  %v1438_v6 = vphi %v1221_v6, %v2314_v6  }
 0x17c   : > { %v2287_v14 = vld [vmem:[#allocation11_spill] sm:$0xff]  ;;  %v2288_v1 = vld [vmem:[#allocation18_spill] sm:$0xff]  ;;  %v2289_v9 = vld [vmem:[#allocation17_spill] sm:$0xff]  ;;  %s649_s3 = scalar_lea.vmem [#allocation2], %s1222_s2  ;;  %s1101_s14 = scalar_lea.vmem %s2142_s5, %s1222_s2 }
 0x17d   : > { %v2291_v10 = vld [vmem:[#allocation8_spill] sm:$0xff]  ;;  %v2292_v5 = vld [vmem:[#allocation10_spill] sm:$0xff]  ;;  %v2293_v4 = vld [vmem:[#allocation9_spill] sm:$0xff]  ;;  %p642_p9 = scmp.ge.s32.totalorder %s645_s12, 8  }
 0x17e   : > { %v2294_v2 = vld [vmem:[#allocation7_spill] sm:$0xff]  ;;  %v2295_v0 = vld [vmem:[#allocation6_spill] sm:$0xff]  ;;  %v1228_v63 = vcombine.high %v1831_v53, %v2292_v5  ;;  %v1226_v13 = vcombine.high %v1825_v62, %v2291_v10  ;;  %v1225_v6 = vcombine.low %v1825_v62, %v2291_v10  ;;  %v1230_v59 = vcombine.high %v2293_v4, %v2287_v14  ;;  %v2301_v10 = vld [vmem:[#allocation20_spill] sm:$0xff] }
 0x17f   : > { %v1224_v3 = vcombine.high %v2295_v0, %v2294_v2  ;;  %v1223_v7 = vcombine.low %v2295_v0, %v2294_v2  ;;  %v1227_v8 = vcombine.low %v1831_v53, %v2292_v5  ;;  %v1229_v2 = vcombine.low %v2293_v4, %v2287_v14  ;;  %v2299_v4 = vld [vmem:[#allocation19_spill] sm:$0xff]  ;;  %v2300_v5 = vld [vmem:[#allocation21_spill] sm:$0xff] }
 0x180   : > { %v2290_v12 = vld [vmem:[#allocation14_spill] sm:$0xff]  ;;  %1034 = vmatprep.subr.bf16.mxu1 %v1226_v13  ;;  %v1236_v13 = vcombine.high %v1847_v18, %v1851_v20 }
 0x181   : > { %993 = vmatprep.subr.bf16.mxu0 %v1224_v3  ;;  %v1232_v0 = vcombine.high %v2286_v15, %v2290_v12  ;;  %1035 = vmatpush1.bf16.msra.mxu1 %v1225_v6  ;;  %v1234_v3 = vcombine.high %v2285_v16, %v2284_v17  ;;  %v1238_v6 = vcombine.high %v1849_v19, %v1853_v21 }
 0x182   : > { %994 = vmatpush1.bf16.msra.mxu0 %v1223_v7  ;;  %1036 = vmatprep.subr.bf16.mxu1 %v1230_v59  ;;  %v1231_v7 = vcombine.low %v2286_v15, %v2290_v12  ;;  %v1235_v59 = vcombine.low %v1847_v18, %v1851_v20 }
 0x183   : > { %995 = vmatprep.subr.bf16.mxu0 %v1228_v63  ;;  %v1233_v63 = vcombine.low %v2285_v16, %v2284_v17 }
 0x185   : > { %1037 = vmatpush1.bf16.msra.mxu1 %v1229_v2  ;;  %v1242_v2 = vcombine.high %v1857_v23, %v1861_v25 }
 0x186   : > { %996 = vmatpush1.bf16.msra.mxu0 %v1227_v8  ;;  %1038 = vmatprep.subr.bf16.mxu1 %v1234_v3  ;;  %v1240_v8 = vcombine.high %v1855_v22, %v1859_v24  ;;  %v1239_v3 = vcombine.low %v1855_v22, %v1859_v24 }
 0x187   : > { %997 = vmatprep.subr.bf16.mxu0 %v1232_v0  ;;  %v1237_v0 = vcombine.low %v1849_v19, %v1853_v21 }
 0x189   : > { %1039 = vmatpush1.bf16.msra.mxu1 %v1233_v63  ;;  %v1241_v63 = vcombine.low %v1857_v23, %v1861_v25 }
 0x18a   : > { %998 = vmatpush1.bf16.msra.mxu0 %v1231_v7  ;;  %1040 = vmatprep.subr.bf16.mxu1 %v1238_v6  ;;  %v651_v7 = vpack.c.bf16 %v1442_v11, %v1442_v11  ;;  %v1246_v6 = vcombine.high %v1865_v27, %v1869_v29  ;;  %v1248_v11 = vcombine.high %v1871_v30, %v1875_v32 }
 0x18b   : > { %999 = vmatprep.subr.bf16.mxu0 %v1236_v13  ;;  %v1244_v13 = vcombine.high %v1863_v26, %v1867_v28 }
 0x18c   : > { %1025 = vmatprep.mubr.bf16.mxu0 %v651_v7  ;;  %1066 = vmatprep.mubr.bf16.mxu1 %v651_v7  ;;  %v1249_v7 = vcombine.low %v1873_v31, %v1877_v33 }
 0x18d   : > { %1041 = vmatpush1.bf16.msra.mxu1 %v1237_v0  ;;  %v1250_v0 = vcombine.high %v1873_v31, %v1877_v33 }
 0x18e   : > { %1000 = vmatpush1.bf16.msra.mxu0 %v1235_v59  ;;  %1042 = vmatprep.subr.bf16.mxu1 %v1242_v2  ;;  %v1243_v59 = vcombine.low %v1863_v26, %v1867_v28  ;;  %v1247_v2 = vcombine.low %v1871_v30, %v1875_v32 }
 0x18f   : > { %1001 = vmatprep.subr.bf16.mxu0 %v1240_v8  ;;  %v1245_v8 = vcombine.low %v1865_v27, %v1869_v29 }
 0x191   : > { %1043 = vmatpush1.bf16.msra.mxu1 %v1241_v63  ;;  %v1251_v63 = vcombine.low %v1879_v34, %v1883_v36 }
 0x192   : > { %1002 = vmatpush1.bf16.msra.mxu0 %v1239_v3  ;;  %1044 = vmatprep.subr.bf16.mxu1 %v1246_v6  ;;  %v1252_v3 = vcombine.high %v1879_v34, %v1883_v36  ;;  %v1256_v6 = vcombine.high %v1887_v38, %v1891_v40 }
 0x193   : > { %1003 = vmatprep.subr.bf16.mxu0 %v1244_v13  ;;  %v1254_v13 = vcombine.high %v1881_v35, %v1885_v37 }
 0x195   : > { %1045 = vmatpush1.bf16.msra.mxu1 %v1245_v8  ;;  %v1255_v8 = vcombine.low %v1887_v38, %v1891_v40 }
 0x196   : > { %1004 = vmatpush1.bf16.msra.mxu0 %v1243_v59  ;;  %1046 = vmatprep.subr.bf16.mxu1 %v1250_v0  ;;  %v1253_v59 = vcombine.low %v1881_v35, %v1885_v37  ;;  %v1260_v0 = vcombine.high %v1895_v42, %v1899_v44 }
 0x197   : > { %1005 = vmatprep.subr.bf16.mxu0 %v1248_v11  ;;  %v1258_v11 = vcombine.high %v1889_v39, %v1893_v41 }
 0x199   : > { %1047 = vmatpush1.bf16.msra.mxu1 %v1249_v7  ;;  %v1259_v7 = vcombine.low %v1895_v42, %v1899_v44 }
 0x19a   : > { %1006 = vmatpush1.bf16.msra.mxu0 %v1247_v2  ;;  %1048 = vmatprep.subr.bf16.mxu1 %v1254_v13  ;;  %v1257_v2 = vcombine.low %v1889_v39, %v1893_v41  ;;  %v1264_v13 = vcombine.high %v1903_v46, %v1907_v48 }
 0x19b   : > { %1007 = vmatprep.subr.bf16.mxu0 %v1252_v3  ;;  %v1262_v3 = vcombine.high %v1897_v43, %v1901_v45 }
 0x19d   : > { %1049 = vmatpush1.bf16.msra.mxu1 %v1253_v59  ;;  %v1263_v59 = vcombine.low %v1903_v46, %v1907_v48 }
 0x19e   : > { %1008 = vmatpush1.bf16.msra.mxu0 %v1251_v63  ;;  %1050 = vmatprep.subr.bf16.mxu1 %v1258_v11  ;;  %v1261_v63 = vcombine.low %v1897_v43, %v1901_v45  ;;  %v1268_v11 = vcombine.high %v1911_v50, %v1915_v52 }
 0x19f   : > { %1009 = vmatprep.subr.bf16.mxu0 %v1256_v6  ;;  %v1266_v6 = vcombine.high %v1905_v47, %v1909_v49 }
 0x1a1   : > { %1051 = vmatpush1.bf16.msra.mxu1 %v1257_v2  ;;  %v1267_v2 = vcombine.low %v1911_v50, %v1915_v52 }
 0x1a2   : > { %1010 = vmatpush1.bf16.msra.mxu0 %v1255_v8  ;;  %1052 = vmatprep.subr.bf16.mxu1 %v1262_v3  ;;  %v1265_v8 = vcombine.low %v1905_v47, %v1909_v49  ;;  %v1272_v3 = vcombine.high %v1919_v55, %v1923_v56 }
 0x1a3   : > { %1011 = vmatprep.subr.bf16.mxu0 %v1260_v0  ;;  %v1270_v0 = vcombine.high %v1913_v51, %v1917_v54 }
 0x1a5   : > { %1053 = vmatpush1.bf16.msra.mxu1 %v1261_v63  ;;  %v1271_v63 = vcombine.low %v1919_v55, %v1923_v56 }
 0x1a6   : > { %1012 = vmatpush1.bf16.msra.mxu0 %v1259_v7  ;;  %1054 = vmatprep.subr.bf16.mxu1 %v1266_v6  ;;  %v1269_v7 = vcombine.low %v1913_v51, %v1917_v54  ;;  %v1276_v6 = vcombine.high %v1927_v61, %v2289_v9 }
 0x1a7   : > { %1013 = vmatprep.subr.bf16.mxu0 %v1264_v13  ;;  %v1274_v13 = vcombine.high %v1921_v58, %v1925_v60 }
 0x1a9   : > { %1055 = vmatpush1.bf16.msra.mxu1 %v1265_v8 }
 0x1aa   : > { %1014 = vmatpush1.bf16.msra.mxu0 %v1263_v59  ;;  %1056 = vmatprep.subr.bf16.mxu1 %v1270_v0  ;;  %v1273_v59 = vcombine.low %v1921_v58, %v1925_v60 }
 0x1ab   : > { %1015 = vmatprep.subr.bf16.mxu0 %v1268_v11  ;;  %v2297_v11 = vld [vmem:[#allocation16_spill] sm:$0xff] }
 0x1ac   : > { %v2298_v8 = vmov %v2297_v11  ;;  %v1278_v0 = vcombine.high %v2297_v11, %v2288_v1  ;;  %v2302_v11 = vld [vmem:[#allocation24_spill] sm:$0xff] }
 0x1ad   : > { %1057 = vmatpush1.bf16.msra.mxu1 %v1269_v7  ;;  %v1277_v7 = vcombine.low %v2298_v8, %v2288_v1  ;;  %v2303_v12 = vmov %v2302_v11  ;;  %v2305_v1 = vld [vmem:[#allocation25_spill] sm:$0xff] }
 0x1ae   : > { %1016 = vmatpush1.bf16.msra.mxu0 %v1267_v2  ;;  %1058 = vmatprep.subr.bf16.mxu1 %v1274_v13  ;;  %v1275_v2 = vcombine.low %v1927_v61, %v2289_v9  ;;  %v1282_v13 = vcombine.high %v2301_v10, %v2300_v5  ;;  %v2304_v9 = vld [vmem:[#allocation22_spill] sm:$0xff] }
 0x1af   : > { %1017 = vmatprep.subr.bf16.mxu0 %v1272_v3  ;;  %v1280_v3 = vcombine.high %v2299_v4, %v1939_v57 }
 0x1b1   : > { %1059 = vmatpush1.bf16.msra.mxu1 %v1273_v59  ;;  %v1281_v59 = vcombine.low %v2301_v10, %v2300_v5 }
 0x1b2   : > { %1018 = vmatpush1.bf16.msra.mxu0 %v1271_v63  ;;  %1060 = vmatprep.subr.bf16.mxu1 %v1278_v0  ;;  %v1279_v63 = vcombine.low %v2299_v4, %v1939_v57  ;;  %v2306_v0 = vld [vmem:[#allocation23_spill] sm:$0xff]  ;;  %v2309_v4 = vld [vmem:[#allocation26_spill] sm:$0xff] }
 0x1b3   : > { %1019 = vmatprep.subr.bf16.mxu0 %v1276_v6  ;;  %v1284_v6 = vcombine.high %v2304_v9, %v2302_v11  ;;  %v1286_v8 = vcombine.high %v2306_v0, %v2305_v1 }
 0x1b5   : > { %1061 = vmatpush1.bf16.msra.mxu1 %v1277_v7  ;;  %v650_v7 = vld [vmem:[%s649_s3] sm:$0xf] }
 0x1b6   : > { %1020 = vmatpush1.bf16.msra.mxu0 %v1275_v2  ;;  %1062 = vmatprep.subr.bf16.mxu1 %v1282_v13  ;;  %v1283_v2 = vcombine.low %v2304_v9, %v2303_v12  ;;  %v2307_v13 = vld [vmem:[#allocation30_spill] sm:$0xff] }
 0x1b7   : > { %1021 = vmatprep.subr.bf16.mxu0 %v1280_v3  ;;  %v1285_v3 = vcombine.low %v2306_v0, %v2305_v1  ;;  %v2308_v11 = vsub.s32 0, %v2307_v13  ;;  %v2310_v5 = vsub.s32 1, %v2307_v13 }
 0x1b9   : > { %1063 = vmatpush1.bf16.msra.mxu1 %v1281_v59 }
 0x1ba   : > { %1022 = vmatpush1.bf16.msra.mxu0 %v1279_v63  ;;  %1064 = vmatprep.subr.bf16.mxu1 %v1286_v8  ;;  %v656_v63 = vrot.slane %v2309_v4, %v2308_v11 }
 0x1bb   : > { %1023 = vmatprep.subr.bf16.mxu0 %v1284_v6  ;;  %v660_v6 = vrot.slane %v2309_v4, %v2310_v5  ;;  %v2312_v5 = vsub.s32 2, %v2307_v13 }
 0x1bd   : > { %1065 = vmatpush1.bf16.msra.mxu1 %v1285_v3  ;;  %v2311_v3 = vsub.s32 3, %v2307_v13 }
 0x1be   : > { %1024 = vmatpush1.bf16.msra.mxu0 %v1283_v2 }
 0x1c0   : > { %1067 = vmatmul.mubr.bf16.vlgmr.msra.gmra.mrb[0].mxu1 %v650_v7 }
 0x1c1   : > { %1026 = vmatmul.mubr.bf16.vlgmr.msra.gmra.mrb[0].mxu0 %v650_v7  ;;  %v668_v7 = vrot.slane %v2309_v4, %v2311_v3 }
 0x293   : > { %v1068_v0 = vpop.f32.mrb[0].mxu1 }
 0x294   : > { %v1027_v59 = vpop.f32.mrb[0].mxu0  ;;  %v1070_v1 = vpop.f32.mrb[1].mxu1 }
 0x295   : > { %v1028_v9 = vadd.f32 %v1027_v59, %v656_v63  ;;  %v1029_v10 = vpop.f32.mrb[1].mxu0  ;;  %v1072_v15 = vpop.f32.mrb[2].mxu1  ;;  %v1071_v17 = vadd.f32 %v1070_v1, %v668_v7  ;;  %v664_v63 = vrot.slane %v2309_v4, %v2312_v5  ;;  %v2313_v7 = vld [vmem:[#allocation31_spill] sm:$0xff] }
 0x296   : > { %v1030_v8 = vadd.f32 %v1029_v10, %v660_v6  ;;  %v1031_v2 = vpop.f32.mrb[2].mxu0  ;;  %v1073_v11 = vpop.f32.mrb[3].mxu1 }
 0x297   : > { %v1287_v12 = vmul.f32 -1.442695, %v1028_v9  ;;  %v1032_v14 = vpop.f32.mrb[3].mxu0  ;;  %v1289_v59 = vmul.f32 -1.442695, %v1071_v17  ;;  %v1069_v10 = vadd.f32 %v1068_v0, %v664_v63 }
 0x298   : > { %v1288_v16 = vmul.f32 -1.442695, %v1030_v8 }
 0x299   : > { %1360 = vpow2.f32 %v1287_v12 }
 0x29a   : > { %1362 = vpow2.f32 %v1288_v16 }
 0x29b   : > { %1364 = vpow2.f32 %v1289_v59 }
 0x29c   : > { %1366 = vtanh.f32 %v1069_v10 }
 0x2a3   : > { %v1361_v6 = vpop.eup %1360 }
 0x2a4   : > { %v1363_v9 = vpop.eup %1362  ;;  %v1078_v14 = vadd.f32 1.0, %v1361_v6 }
 0x2a5   : > { %v1084_v2 = vadd.f32 1.0, %v1363_v9  ;;  %v1365_v15 = vpop.eup %1364 }
 0x2a6   : > { %1368 = vrcp.f32 %v1078_v14  ;;  %v1367_v8 = vpop.eup %1366  ;;  %v1091_v16 = vadd.f32 1.0, %v1365_v15 }
 0x2a7   : > { %1370 = vrcp.f32 %v1084_v2 }
 0x2a8   : > { %1372 = vrcp.f32 %v1091_v16 }
 0x2b0   : > { %v1369_v12 = vpop.eup %1368 }
 0x2b1   : > { %v1371_v1 = vpop.eup %1370  ;;  %v1095_v3 = vmul.f32 %v1369_v12, %v1367_v8 }
 0x2b2   : > { %v1094_v11 = vmul.f32 %v2313_v7, %v1371_v1  ;;  %v1373_v17 = vpop.eup %1372 }
 0x2b4   : > { %v1096_v5 = vadd.f32 %v1095_v3, %v1094_v11  }
 0x2b6   : > { %1374 = vtanh.f32 %v1096_v5  ;;  %v2314_v6 = vmov %v1096_v5  ;;  %1292 = vst [vmem:[%s2144_s7 + $0x8] sm:$0xff] (%p642_p9), %v1096_v5 }
 0x2bf   :  { %644 = sbr.rel (!%p642_p9) target bundleno = 379 (0x17b), region = 95 }
 0x2c0   : > { %v1375_v0 = vpop.eup %1374 }
 0x2c1   : > { %v1098_v63 = vmul.f32 %v1375_v0, %v1373_v17  }
 0x2c3   : > { %v1099_v59 = vpack.c.bf16 %v1098_v63, %v1098_v63  ;;  %v2315_v11 = vmov %v1098_v63  ;;  %1291 = vst [vmem:[%s2143_s6 + $0x8] sm:$0xff] (%p642_p9), %v1098_v63 }
 0x2c5   : > { %1102 = vst [vmem:[%s1101_s14] sm:$0xf] %v1099_v59 }
 0x2c6   :  { %1119 = vsyncpa [#allocation4], 1 }

</bundles_post_ra>
